<compile_context>
chip_gen: v5e
topology: v5e:2x2
jax: 0.10.0
libtpu: 0.0.40
codegen_flags: <defaults>
</compile_context>

<pallas_src>
import functools

import jax
import jax.numpy as jnp
from jax import lax
from jax.experimental import pallas as pl
from jax.experimental.pallas import tpu as pltpu


# ---------------------------------------------------------------------------
# Fused kernel: cv1 (1x1 conv + folded BN + SiLU) -> DualConv (grouped 3x3 +
# pointwise 1x1, fused into one matmul per group) -> residual.
# One image laid out as (C, H*W): channels on sublanes, spatial on lanes.
# ---------------------------------------------------------------------------
def _bottleneck_kernel(x_ref, w1_ref, b1_ref, wc_ref, o_ref, patch_ref,
                       *, H, W, M, g, add):
    """patch_ref is a zero-margined bf16 scratch, shape (9*ig + c_, HW + 2*M):
         rows [0, 9*ig)       : per-group 9-tap shifted copies of the group's y
         rows [9*ig, 9*ig+c_) : the full y (pointwise-conv contraction block)
       Reading the lane-aligned window [M, M+HW) realizes the 3x3 'SAME'
       shifts; the H border comes from the zero bands, the W border from
       masking the stored y columns for the dw = +-1 taps."""
    HW = H * W
    x = x_ref[0]                                   # (C1, HW)
    xb = x.astype(jnp.bfloat16)

    # ---- cv1: 1x1 conv (BN scale pre-folded) + folded bias, SiLU (f32) ------
    z = jnp.dot(w1_ref[...], xb, preferred_element_type=jnp.float32)  # (c_, HW)
    z = z + b1_ref[...]
    y = z * jax.nn.sigmoid(z)                      # SiLU, f32
    yb = y.astype(jnp.bfloat16)                    # (c_, HW) bf16

    c_ = yb.shape[0]
    c2 = o_ref.shape[1]
    ig = c_ // g                                   # input channels per group
    og = c2 // g                                   # output channels per group
    P = 9 * ig                                     # patch (tap) rows

    # ---- H-border zero bands.  Narrow (>= W+1 lanes), re-zeroed every grid
    # step so correctness never depends on scratch state from other steps /
    # cores.  Invariant: read-window positions that must stay zero are never
    # written by any tap store (each tap's store misses them by construction).
    Wb = min(HW, max(W + 1, 128))
    patch_ref[0:P, M:M + Wb] = jnp.zeros((P, Wb), patch_ref.dtype)
    patch_ref[0:P, M + HW - Wb:M + HW] = jnp.zeros((P, Wb), patch_ref.dtype)

    # ---- pointwise branch RHS: full y stored once, lane-aligned -------------
    patch_ref[P:P + c_, M:M + HW] = yb

    # ---- tiny (1, HW) W-border lane masks (mask the STORED column: for a
    # dw=+1 tap the invalid destination pixel reads stored column 0; for a
    # dw=-1 tap it reads stored column W-1).
    col = lax.broadcasted_iota(jnp.int32, (1, HW), 1) % W
    not_first = col != 0                           # applied to dw = +1 taps
    not_last = col != (W - 1)                      # applied to dw = -1 taps

    for gi in range(g):
        ysl = yb[gi * ig:(gi + 1) * ig]            # (ig, HW) bf16
        tap_src = {
            -1: jnp.where(not_last, ysl, 0),
            0: ysl,
            1: jnp.where(not_first, ysl, 0),
        }
        for kh in range(3):
            for kw in range(3):
                t = kh * 3 + kw
                s = (kh - 1) * W + (kw - 1)
                # Storing y at lane offset M - s makes the fixed read window
                # [M, M + HW) equivalent to a shift by s = dh*W + dw.
                patch_ref[t * ig:(t + 1) * ig, M - s:M - s + HW] = tap_src[kw - 1]

        # Fused grouped-3x3 + pointwise matmul:
        #   (og, 9*ig + c_) @ (9*ig + c_, HW), lane-aligned RHS, f32 accum.
        rhs = patch_ref[:, M:M + HW]
        res = jnp.dot(wc_ref[gi * og:(gi + 1) * og, :], rhs,
                      preferred_element_type=jnp.float32)          # (og, HW)
        if add:
            res = res + x[gi * og:(gi + 1) * og, :].astype(jnp.float32)
        o_ref[0, gi * og:(gi + 1) * og, :] = res.astype(o_ref.dtype)


# ---------------------------------------------------------------------------
# Wrapper
# ---------------------------------------------------------------------------
def bottleneck_forward(x, params, *, g=4, shortcut=True, eps=1e-5):
    N, C1, H, W = x.shape
    HW = H * W
    w1 = params["w1"]            # (c_, C1)          cv1 1x1 conv weight
    gamma = params["bn_gamma"]   # (c_,)
    beta = params["bn_beta"]     # (c_,)
    mean = params["bn_mean"]     # (c_,)
    var = params["bn_var"]       # (c_,)
    wg = params["wg"]            # (c2, c_/g, 3, 3)  grouped 3x3 conv weight
    wp = params["wp"]            # (c2, c_, 1, 1)    pointwise conv weight

    c_ = w1.shape[0]
    c2 = wg.shape[0]
    assert c_ % g == 0 and c2 % g == 0, "DualConv group divisibility"
    ig, og = c_ // g, c2 // g
    # Layout minima: sublane-aligned channel blocks and lane-dense spatial.
    assert ig % 8 == 0 and og % 8 == 0, (
        f"ig={ig}, og={og}: per-group channel counts must be multiples of 8")
    assert HW % 128 == 0, (
        f"H*W={HW} must be a multiple of 128 (pad W for odd feature-map sizes)")
    add = bool(shortcut and C1 == c2)

    # Fold inference-mode BN into the cv1 weight (scale) and a per-channel bias.
    scale = gamma / jnp.sqrt(var + eps)                                  # (c_,)
    w1f = (w1.astype(jnp.float32) * scale[:, None]).astype(jnp.bfloat16)
    b1 = (beta - mean * scale).reshape(c_, 1).astype(jnp.float32)

    # Fused cv2 weight: [grouped-3x3 (tap-major, local-channel-minor) | pointwise].
    # Column layout matches the patch-scratch row layout inside the kernel.
    wg_k = jnp.transpose(wg, (0, 2, 3, 1)).reshape(c2, 9 * ig)
    wp_k = wp.reshape(c2, c_)
    wc = jnp.concatenate([wg_k, wp_k], axis=1).astype(jnp.bfloat16)

    # 128-aligned zero margin (>= W+1): the hot matmul RHS read is lane-aligned.
    M = ((W + 1 + 127) // 128) * 128

    x2 = x.reshape(N, C1, HW)

    # VMEM budget: double-buffered IO blocks + weights + bf16 patch scratch +
    # rough allowance for in-kernel f32 temporaries (z, y, res, masks).
    itemsize = jnp.dtype(x.dtype).itemsize
    est = (2 * (C1 + c2) * HW * itemsize
           + 2 * (w1f.size + wc.size) * 2 + 2 * c_ * 128 * 4
           + (9 * ig + c_) * (HW + 2 * M) * 2
           + (6 * c_ + 3 * og) * HW * 4)
    vmem_limit = int(min(max(2 * est, 32 * 1024 * 1024), 64 * 1024 * 1024))

    out = pl.pallas_call(
        functools.partial(_bottleneck_kernel, H=H, W=W, M=M, g=g, add=add),
        out_shape=jax.ShapeDtypeStruct((N, c2, HW), x.dtype),
        grid_spec=pltpu.PrefetchScalarGridSpec(
            num_scalar_prefetch=0,
            grid=(N,),
            in_specs=[
                pl.BlockSpec((1, C1, HW), lambda n: (n, 0, 0)),
                pl.BlockSpec((c_, C1), lambda n: (0, 0)),
                pl.BlockSpec((c_, 1), lambda n: (0, 0)),
                pl.BlockSpec((c2, 9 * ig + c_), lambda n: (0, 0)),
            ],
            out_specs=pl.BlockSpec((1, c2, HW), lambda n: (n, 0, 0)),
            scratch_shapes=[
                pltpu.VMEM((9 * ig + c_, HW + 2 * M), jnp.bfloat16),
            ],
        ),
        compiler_params=pltpu.CompilerParams(
            dimension_semantics=("parallel",),
            vmem_limit_bytes=vmem_limit),
    )(x2, w1f, b1, wc)

    return out.reshape(N, c2, H, W)


# ---------------------------------------------------------------------------
# Pure-JAX reference (for correctness check)
# ---------------------------------------------------------------------------
def bottleneck_reference(x, params, *, g=4, shortcut=True, eps=1e-5):
    dn = ("NCHW", "OIHW", "NCHW")
    w1, wg, wp = params["w1"], params["wg"], params["wp"]
    c_, c1 = w1.shape
    c2 = wg.shape[0]
    z = lax.conv_general_dilated(x, w1.reshape(c_, c1, 1, 1), (1, 1), "SAME",
                                 dimension_numbers=dn)
    z = ((z - params["bn_mean"].reshape(1, -1, 1, 1))
         / jnp.sqrt(params["bn_var"].reshape(1, -1, 1, 1) + eps)
         * params["bn_gamma"].reshape(1, -1, 1, 1)
         + params["bn_beta"].reshape(1, -1, 1, 1))
    y = z * jax.nn.sigmoid(z)
    gc = lax.conv_general_dilated(y, wg, (1, 1), "SAME",
                                  feature_group_count=g, dimension_numbers=dn)
    pwc = lax.conv_general_dilated(y, wp, (1, 1), "SAME", dimension_numbers=dn)
    out = gc + pwc
    return x + out if (shortcut and c1 == c2) else out


# ---------------------------------------------------------------------------
if __name__ == "__main__":
    # Bottleneck(c1=64, c2=64, shortcut=True, e=0.5) -> c_ = 32, DualConv g=4.
    # ig = 8, og = 16 keep channel blocks sublane-aligned; HW = 256 is
    # lane-dense (multiples of 128).
    N, C1, C2, H, W = 2, 64, 64, 16, 16
    C_ = int(C2 * 0.5)
    G = 4

    key = jax.random.PRNGKey(0)
    kx, k1, k2, k3, k4, k5, k6, k7 = jax.random.split(key, 8)

    x = jax.random.normal(kx, (N, C1, H, W), jnp.float32)

    params = {
        "w1": 0.1 * jax.random.normal(k1, (C_, C1), jnp.float32),
        "bn_gamma": 1.0 + 0.1 * jax.random.normal(k2, (C_,), jnp.float32),
        "bn_beta": 0.1 * jax.random.normal(k3, (C_,), jnp.float32),
        "bn_mean": 0.05 * jax.random.normal(k4, (C_,), jnp.float32),
        "bn_var": 1.0 + 0.1 * jax.random.uniform(k5, (C_,), jnp.float32),
        "wg": 0.1 * jax.random.normal(k6, (C2, C_ // G, 3, 3), jnp.float32),
        "wp": 0.1 * jax.random.normal(k7, (C2, C_, 1, 1), jnp.float32),
    }

    out = bottleneck_forward(x, params, g=G, shortcut=True)
    out = jax.block_until_ready(out)

    ref = bottleneck_reference(x, params, g=G, shortcut=True)
    assert out.shape == (N, C2, H, W), out.shape
    # bf16 MXU operands (f32 accumulation) over a 104-term contraction ->
    # slightly looser tolerance than a pure-f32 path.
    assert jnp.allclose(out, ref, atol=3e-2, rtol=3e-2), (
        "mismatch vs reference, max abs err = "
        f"{float(jnp.max(jnp.abs(out - ref)))}"
    )

    print("KERNEL_OK")
</pallas_src>

<mosaic_0001>
module attributes {stable_mosaic.version = 11 : i64} {
  func.func @_bottleneck_kernel(%arg0: i32, %arg1: memref<1x64x256xf32, #tpu.memory_space<vmem>>, %arg2: memref<32x64xbf16, #tpu.memory_space<vmem>>, %arg3: memref<32x1xf32, #tpu.memory_space<vmem>>, %arg4: memref<64x104xbf16, #tpu.memory_space<vmem>>, %arg5: memref<1x64x256xf32, #tpu.memory_space<vmem>>, %arg6: memref<104x512xbf16, #tpu.memory_space<vmem>>) attributes {dimension_semantics = [#tpu.dimension_semantics<parallel>], iteration_bounds = array<i64: 2>, scalar_prefetch = 0 : i64, scratch_operands = 1 : i64, tpu.core_type = #tpu.core_type<tc>, window_params = [{transform_indices = @transform_0, window_bounds = array<i64: 1, 64, 256>}, {pipeline_mode = #tpu.pipeline_mode<synchronous>, transform_indices = @transform_1, window_bounds = array<i64: 32, 64>}, {pipeline_mode = #tpu.pipeline_mode<synchronous>, transform_indices = @transform_2, window_bounds = array<i64: 32, 1>}, {pipeline_mode = #tpu.pipeline_mode<synchronous>, transform_indices = @transform_3, window_bounds = array<i64: 64, 104>}, {transform_indices = @transform_4, window_bounds = array<i64: 1, 64, 256>}]} {
    %c0 = arith.constant 0 : index
    %c0_0 = arith.constant 0 : index
    %c0_1 = arith.constant 0 : index
    %0 = vector.load %arg1[%c0, %c0_0, %c0_1] : memref<1x64x256xf32, #tpu.memory_space<vmem>>, vector<1x64x256xf32>
    %1 = vector.shape_cast %0 : vector<1x64x256xf32> to vector<64x256xf32>
    %2 = arith.truncf %1 : vector<64x256xf32> to vector<64x256xbf16>
    %c0_2 = arith.constant 0 : index
    %c0_3 = arith.constant 0 : index
    %3 = vector.load %arg2[%c0_2, %c0_3] : memref<32x64xbf16, #tpu.memory_space<vmem>>, vector<32x64xbf16>
    %cst = arith.constant dense<0.000000e+00> : vector<32x256xf32>
    %4 = tpu.matmul %3, %2, %cst {dimension_numbers = #tpu.dot_dimension_numbers<[1], [0], [0], [1], [0, 0, 1, 1], [], []>} : vector<32x64xbf16>, vector<64x256xbf16>, vector<32x256xf32> -> vector<32x256xf32>
    %c0_4 = arith.constant 0 : index
    %c0_5 = arith.constant 0 : index
    %5 = vector.load %arg3[%c0_4, %c0_5] : memref<32x1xf32, #tpu.memory_space<vmem>>, vector<32x1xf32>
    %6 = vector.broadcast %5 : vector<32x1xf32> to vector<32x256xf32>
    %7 = arith.addf %4, %6 : vector<32x256xf32>
    %8 = arith.negf %7 : vector<32x256xf32>
    %9 = math.exp %8 : vector<32x256xf32>
    %cst_6 = arith.constant 1.000000e+00 : f32
    %10 = vector.broadcast %cst_6 : f32 to vector<32x256xf32>
    %11 = arith.addf %10, %9 : vector<32x256xf32>
    %12 = arith.divf %10, %11 : vector<32x256xf32>
    %13 = arith.mulf %7, %12 : vector<32x256xf32>
    %14 = arith.truncf %13 : vector<32x256xf32> to vector<32x256xbf16>
    %cst_7 = arith.constant 0.000000e+00 : bf16
    %15 = vector.broadcast %cst_7 : bf16 to vector<72x128xbf16>
    %c0_8 = arith.constant 0 : index
    %c128 = arith.constant 128 : index
    %16 = vector.load %arg6[%c0_8, %c128] : memref<104x512xbf16, #tpu.memory_space<vmem>>, vector<72x128xbf16>
    tpu.vector_store %arg6[%c0_8, %c128], %15 {strides = array<i32>} : memref<104x512xbf16, #tpu.memory_space<vmem>>, vector<72x128xbf16>,
    %cst_9 = arith.constant 0.000000e+00 : bf16
    %17 = vector.broadcast %cst_9 : bf16 to vector<72x128xbf16>
    %c0_10 = arith.constant 0 : index
    %c256 = arith.constant 256 : index
    %18 = vector.load %arg6[%c0_10, %c256] : memref<104x512xbf16, #tpu.memory_space<vmem>>, vector<72x128xbf16>
    tpu.vector_store %arg6[%c0_10, %c256], %17 {strides = array<i32>} : memref<104x512xbf16, #tpu.memory_space<vmem>>, vector<72x128xbf16>,
    %c72 = arith.constant 72 : index
    %c128_11 = arith.constant 128 : index
    %19 = vector.load %arg6[%c72, %c128_11] : memref<104x512xbf16, #tpu.memory_space<vmem>>, vector<32x256xbf16>
    tpu.vector_store %arg6[%c72, %c128_11], %14 {strides = array<i32>} : memref<104x512xbf16, #tpu.memory_space<vmem>>, vector<32x256xbf16>,
    %20 = tpu.iota {dimensions = array<i32: 1>} : vector<1x256xi32>
    %c16_i32 = arith.constant 16 : i32
    %c0_i32 = arith.constant 0 : i32
    %21 = arith.cmpi eq, %c16_i32, %c0_i32 : i32
    %c1_i32 = arith.constant 1 : i32
    %22 = arith.select %21, %c1_i32, %c16_i32 : i32
    %23 = vector.broadcast %22 : i32 to vector<1x256xi32>
    %24 = arith.remsi %20, %23 : vector<1x256xi32>
    %c0_i32_12 = arith.constant 0 : i32
    %25 = vector.broadcast %c0_i32_12 : i32 to vector<1x256xi32>
    %26 = arith.cmpi ne, %24, %25 : vector<1x256xi32>
    %c0_i32_13 = arith.constant 0 : i32
    %27 = vector.broadcast %c0_i32_13 : i32 to vector<1x256xi32>
    %28 = arith.cmpi slt, %24, %27 : vector<1x256xi32>
    %c0_i32_14 = arith.constant 0 : i32
    %29 = arith.cmpi slt, %22, %c0_i32_14 : i32
    %30 = vector.broadcast %29 : i1 to vector<1x256xi1>
    %31 = vector.broadcast %30 : vector<1x256xi1> to vector<1x256xi1>
    %32 = arith.xori %28, %31 : vector<1x256xi1>
    %33 = arith.andi %32, %26 : vector<1x256xi1>
    %34 = vector.broadcast %22 : i32 to vector<1x256xi32>
    %35 = arith.addi %24, %34 : vector<1x256xi32>
    %36 = arith.select %33, %35, %24 : vector<1x256xi1>, vector<1x256xi32>
    %c0_i32_15 = arith.constant 0 : i32
    %37 = vector.broadcast %c0_i32_15 : i32 to vector<1x256xi32>
    %38 = arith.cmpi ne, %36, %37 : vector<1x256xi32>
    %c15_i32 = arith.constant 15 : i32
    %39 = vector.broadcast %c15_i32 : i32 to vector<1x256xi32>
    %40 = arith.cmpi ne, %36, %39 : vector<1x256xi32>
    %41 = vector.extract_strided_slice %14 {offsets = [0, 0], sizes = [8, 256], strides = [1, 1]} : vector<32x256xbf16> to vector<8x256xbf16>
    %c0_i32_16 = arith.constant 0 : i32
    %42 = arith.sitofp %c0_i32_16 : i32 to bf16
    %43 = vector.shape_cast %40 : vector<1x256xi1> to vector<1x256xi1>
    %44 = vector.broadcast %43 : vector<1x256xi1> to vector<8x256xi1>
    %45 = vector.broadcast %42 : bf16 to vector<8x256xbf16>
    %46 = arith.select %44, %41, %45 : vector<8x256xi1>, vector<8x256xbf16>
    %c0_i32_17 = arith.constant 0 : i32
    %47 = arith.sitofp %c0_i32_17 : i32 to bf16
    %48 = vector.shape_cast %38 : vector<1x256xi1> to vector<1x256xi1>
    %49 = vector.broadcast %48 : vector<1x256xi1> to vector<8x256xi1>
    %50 = vector.broadcast %47 : bf16 to vector<8x256xbf16>
    %51 = arith.select %49, %41, %50 : vector<8x256xi1>, vector<8x256xbf16>
    %c0_18 = arith.constant 0 : index
    %c145 = arith.constant 145 : index
    %52 = vector.load %arg6[%c0_18, %c145] : memref<104x512xbf16, #tpu.memory_space<vmem>>, vector<8x256xbf16>
    tpu.vector_store %arg6[%c0_18, %c145], %46 {strides = array<i32>} : memref<104x512xbf16, #tpu.memory_space<vmem>>, vector<8x256xbf16>,
    %c8 = arith.constant 8 : index
    %c144 = arith.constant 144 : index
    %53 = vector.load %arg6[%c8, %c144] : memref<104x512xbf16, #tpu.memory_space<vmem>>, vector<8x256xbf16>
    tpu.vector_store %arg6[%c8, %c144], %41 {strides = array<i32>} : memref<104x512xbf16, #tpu.memory_space<vmem>>, vector<8x256xbf16>,
    %c16 = arith.constant 16 : index
    %c143 = arith.constant 143 : index
    %54 = vector.load %arg6[%c16, %c143] : memref<104x512xbf16, #tpu.memory_space<vmem>>, vector<8x256xbf16>
    tpu.vector_store %arg6[%c16, %c143], %51 {strides = array<i32>} : memref<104x512xbf16, #tpu.memory_space<vmem>>, vector<8x256xbf16>,
    %c24 = arith.constant 24 : index
    %c129 = arith.constant 129 : index
    %55 = vector.load %arg6[%c24, %c129] : memref<104x512xbf16, #tpu.memory_space<vmem>>, vector<8x256xbf16>
    tpu.vector_store %arg6[%c24, %c129], %46 {strides = array<i32>} : memref<104x512xbf16, #tpu.memory_space<vmem>>, vector<8x256xbf16>,
    %c32 = arith.constant 32 : index
    %c128_19 = arith.constant 128 : index
    %56 = vector.load %arg6[%c32, %c128_19] : memref<104x512xbf16, #tpu.memory_space<vmem>>, vector<8x256xbf16>
    tpu.vector_store %arg6[%c32, %c128_19], %41 {strides = array<i32>} : memref<104x512xbf16, #tpu.memory_space<vmem>>, vector<8x256xbf16>,
    %c40 = arith.constant 40 : index
    %c127 = arith.constant 127 : index
    %57 = vector.load %arg6[%c40, %c127] : memref<104x512xbf16, #tpu.memory_space<vmem>>, vector<8x256xbf16>
    tpu.vector_store %arg6[%c40, %c127], %51 {strides = array<i32>} : memref<104x512xbf16, #tpu.memory_space<vmem>>, vector<8x256xbf16>,
    %c48 = arith.constant 48 : index
    %c113 = arith.constant 113 : index
    %58 = vector.load %arg6[%c48, %c113] : memref<104x512xbf16, #tpu.memory_space<vmem>>, vector<8x256xbf16>
    tpu.vector_store %arg6[%c48, %c113], %46 {strides = array<i32>} : memref<104x512xbf16, #tpu.memory_space<vmem>>, vector<8x256xbf16>,
    %c56 = arith.constant 56 : index
    %c112 = arith.constant 112 : index
    %59 = vector.load %arg6[%c56, %c112] : memref<104x512xbf16, #tpu.memory_space<vmem>>, vector<8x256xbf16>
    tpu.vector_store %arg6[%c56, %c112], %41 {strides = array<i32>} : memref<104x512xbf16, #tpu.memory_space<vmem>>, vector<8x256xbf16>,
    %c64 = arith.constant 64 : index
    %c111 = arith.constant 111 : index
    %60 = vector.load %arg6[%c64, %c111] : memref<104x512xbf16, #tpu.memory_space<vmem>>, vector<8x256xbf16>
    tpu.vector_store %arg6[%c64, %c111], %51 {strides = array<i32>} : memref<104x512xbf16, #tpu.memory_space<vmem>>, vector<8x256xbf16>,
    %c0_20 = arith.constant 0 : index
    %c128_21 = arith.constant 128 : index
    %61 = vector.load %arg6[%c0_20, %c128_21] : memref<104x512xbf16, #tpu.memory_space<vmem>>, vector<104x256xbf16>
    %c0_22 = arith.constant 0 : index
    %c0_23 = arith.constant 0 : index
    %62 = vector.load %arg4[%c0_22, %c0_23] : memref<64x104xbf16, #tpu.memory_space<vmem>>, vector<16x104xbf16>
    %cst_24 = arith.constant dense<0.000000e+00> : vector<16x256xf32>
    %63 = tpu.matmul %62, %61, %cst_24 {dimension_numbers = #tpu.dot_dimension_numbers<[1], [0], [0], [1], [0, 0, 1, 1], [], []>} : vector<16x104xbf16>, vector<104x256xbf16>, vector<16x256xf32> -> vector<16x256xf32>
    %64 = vector.extract_strided_slice %1 {offsets = [0, 0], sizes = [16, 256], strides = [1, 1]} : vector<64x256xf32> to vector<16x256xf32>
    %65 = arith.addf %63, %64 : vector<16x256xf32>
    %c0_25 = arith.constant 0 : index
    %c0_26 = arith.constant 0 : index
    %c0_27 = arith.constant 0 : index
    %66 = vector.load %arg5[%c0_25, %c0_26, %c0_27] : memref<1x64x256xf32, #tpu.memory_space<vmem>>, vector<1x16x256xf32>
    %67 = vector.shape_cast %66 : vector<1x16x256xf32> to vector<16x256xf32>
    %68 = vector.shape_cast %65 : vector<16x256xf32> to vector<1x16x256xf32>
    tpu.vector_store %arg5[%c0_25, %c0_26, %c0_27], %68 {strides = array<i32>} : memref<1x64x256xf32, #tpu.memory_space<vmem>>, vector<1x16x256xf32>,
    %69 = vector.extract_strided_slice %14 {offsets = [8, 0], sizes = [8, 256], strides = [1, 1]} : vector<32x256xbf16> to vector<8x256xbf16>
    %c0_i32_28 = arith.constant 0 : i32
    %70 = arith.sitofp %c0_i32_28 : i32 to bf16
    %71 = vector.shape_cast %40 : vector<1x256xi1> to vector<1x256xi1>
    %72 = vector.broadcast %71 : vector<1x256xi1> to vector<8x256xi1>
    %73 = vector.broadcast %70 : bf16 to vector<8x256xbf16>
    %74 = arith.select %72, %69, %73 : vector<8x256xi1>, vector<8x256xbf16>
    %c0_i32_29 = arith.constant 0 : i32
    %75 = arith.sitofp %c0_i32_29 : i32 to bf16
    %76 = vector.shape_cast %38 : vector<1x256xi1> to vector<1x256xi1>
    %77 = vector.broadcast %76 : vector<1x256xi1> to vector<8x256xi1>
    %78 = vector.broadcast %75 : bf16 to vector<8x256xbf16>
    %79 = arith.select %77, %69, %78 : vector<8x256xi1>, vector<8x256xbf16>
    %c0_30 = arith.constant 0 : index
    %c145_31 = arith.constant 145 : index
    %80 = vector.load %arg6[%c0_30, %c145_31] : memref<104x512xbf16, #tpu.memory_space<vmem>>, vector<8x256xbf16>
    tpu.vector_store %arg6[%c0_30, %c145_31], %74 {strides = array<i32>} : memref<104x512xbf16, #tpu.memory_space<vmem>>, vector<8x256xbf16>,
    %c8_32 = arith.constant 8 : index
    %c144_33 = arith.constant 144 : index
    %81 = vector.load %arg6[%c8_32, %c144_33] : memref<104x512xbf16, #tpu.memory_space<vmem>>, vector<8x256xbf16>
    tpu.vector_store %arg6[%c8_32, %c144_33], %69 {strides = array<i32>} : memref<104x512xbf16, #tpu.memory_space<vmem>>, vector<8x256xbf16>,
    %c16_34 = arith.constant 16 : index
    %c143_35 = arith.constant 143 : index
    %82 = vector.load %arg6[%c16_34, %c143_35] : memref<104x512xbf16, #tpu.memory_space<vmem>>, vector<8x256xbf16>
    tpu.vector_store %arg6[%c16_34, %c143_35], %79 {strides = array<i32>} : memref<104x512xbf16, #tpu.memory_space<vmem>>, vector<8x256xbf16>,
    %c24_36 = arith.constant 24 : index
    %c129_37 = arith.constant 129 : index
    %83 = vector.load %arg6[%c24_36, %c129_37] : memref<104x512xbf16, #tpu.memory_space<vmem>>, vector<8x256xbf16>
    tpu.vector_store %arg6[%c24_36, %c129_37], %74 {strides = array<i32>} : memref<104x512xbf16, #tpu.memory_space<vmem>>, vector<8x256xbf16>,
    %c32_38 = arith.constant 32 : index
    %c128_39 = arith.constant 128 : index
    %84 = vector.load %arg6[%c32_38, %c128_39] : memref<104x512xbf16, #tpu.memory_space<vmem>>, vector<8x256xbf16>
    tpu.vector_store %arg6[%c32_38, %c128_39], %69 {strides = array<i32>} : memref<104x512xbf16, #tpu.memory_space<vmem>>, vector<8x256xbf16>,
    %c40_40 = arith.constant 40 : index
    %c127_41 = arith.constant 127 : index
    %85 = vector.load %arg6[%c40_40, %c127_41] : memref<104x512xbf16, #tpu.memory_space<vmem>>, vector<8x256xbf16>
    tpu.vector_store %arg6[%c40_40, %c127_41], %79 {strides = array<i32>} : memref<104x512xbf16, #tpu.memory_space<vmem>>, vector<8x256xbf16>,
    %c48_42 = arith.constant 48 : index
    %c113_43 = arith.constant 113 : index
    %86 = vector.load %arg6[%c48_42, %c113_43] : memref<104x512xbf16, #tpu.memory_space<vmem>>, vector<8x256xbf16>
    tpu.vector_store %arg6[%c48_42, %c113_43], %74 {strides = array<i32>} : memref<104x512xbf16, #tpu.memory_space<vmem>>, vector<8x256xbf16>,
    %c56_44 = arith.constant 56 : index
    %c112_45 = arith.constant 112 : index
    %87 = vector.load %arg6[%c56_44, %c112_45] : memref<104x512xbf16, #tpu.memory_space<vmem>>, vector<8x256xbf16>
    tpu.vector_store %arg6[%c56_44, %c112_45], %69 {strides = array<i32>} : memref<104x512xbf16, #tpu.memory_space<vmem>>, vector<8x256xbf16>,
    %c64_46 = arith.constant 64 : index
    %c111_47 = arith.constant 111 : index
    %88 = vector.load %arg6[%c64_46, %c111_47] : memref<104x512xbf16, #tpu.memory_space<vmem>>, vector<8x256xbf16>
    tpu.vector_store %arg6[%c64_46, %c111_47], %79 {strides = array<i32>} : memref<104x512xbf16, #tpu.memory_space<vmem>>, vector<8x256xbf16>,
    %c0_48 = arith.constant 0 : index
    %c128_49 = arith.constant 128 : index
    %89 = vector.load %arg6[%c0_48, %c128_49] : memref<104x512xbf16, #tpu.memory_space<vmem>>, vector<104x256xbf16>
    %c16_50 = arith.constant 16 : index
    %c0_51 = arith.constant 0 : index
    %90 = vector.load %arg4[%c16_50, %c0_51] : memref<64x104xbf16, #tpu.memory_space<vmem>>, vector<16x104xbf16>
    %cst_52 = arith.constant dense<0.000000e+00> : vector<16x256xf32>
    %91 = tpu.matmul %90, %89, %cst_52 {dimension_numbers = #tpu.dot_dimension_numbers<[1], [0], [0], [1], [0, 0, 1, 1], [], []>} : vector<16x104xbf16>, vector<104x256xbf16>, vector<16x256xf32> -> vector<16x256xf32>
    %92 = vector.extract_strided_slice %1 {offsets = [16, 0], sizes = [16, 256], strides = [1, 1]} : vector<64x256xf32> to vector<16x256xf32>
    %93 = arith.addf %91, %92 : vector<16x256xf32>
    %c0_53 = arith.constant 0 : index
    %c16_54 = arith.constant 16 : index
    %c0_55 = arith.constant 0 : index
    %94 = vector.load %arg5[%c0_53, %c16_54, %c0_55] : memref<1x64x256xf32, #tpu.memory_space<vmem>>, vector<1x16x256xf32>
    %95 = vector.shape_cast %94 : vector<1x16x256xf32> to vector<16x256xf32>
    %96 = vector.shape_cast %93 : vector<16x256xf32> to vector<1x16x256xf32>
    tpu.vector_store %arg5[%c0_53, %c16_54, %c0_55], %96 {strides = array<i32>} : memref<1x64x256xf32, #tpu.memory_space<vmem>>, vector<1x16x256xf32>,
    %97 = vector.extract_strided_slice %14 {offsets = [16, 0], sizes = [8, 256], strides = [1, 1]} : vector<32x256xbf16> to vector<8x256xbf16>
    %c0_i32_56 = arith.constant 0 : i32
    %98 = arith.sitofp %c0_i32_56 : i32 to bf16
    %99 = vector.shape_cast %40 : vector<1x256xi1> to vector<1x256xi1>
    %100 = vector.broadcast %99 : vector<1x256xi1> to vector<8x256xi1>
    %101 = vector.broadcast %98 : bf16 to vector<8x256xbf16>
    %102 = arith.select %100, %97, %101 : vector<8x256xi1>, vector<8x256xbf16>
    %c0_i32_57 = arith.constant 0 : i32
    %103 = arith.sitofp %c0_i32_57 : i32 to bf16
    %104 = vector.shape_cast %38 : vector<1x256xi1> to vector<1x256xi1>
    %105 = vector.broadcast %104 : vector<1x256xi1> to vector<8x256xi1>
    %106 = vector.broadcast %103 : bf16 to vector<8x256xbf16>
    %107 = arith.select %105, %97, %106 : vector<8x256xi1>, vector<8x256xbf16>
    %c0_58 = arith.constant 0 : index
    %c145_59 = arith.constant 145 : index
    %108 = vector.load %arg6[%c0_58, %c145_59] : memref<104x512xbf16, #tpu.memory_space<vmem>>, vector<8x256xbf16>
    tpu.vector_store %arg6[%c0_58, %c145_59], %102 {strides = array<i32>} : memref<104x512xbf16, #tpu.memory_space<vmem>>, vector<8x256xbf16>,
    %c8_60 = arith.constant 8 : index
    %c144_61 = arith.constant 144 : index
    %109 = vector.load %arg6[%c8_60, %c144_61] : memref<104x512xbf16, #tpu.memory_space<vmem>>, vector<8x256xbf16>
    tpu.vector_store %arg6[%c8_60, %c144_61], %97 {strides = array<i32>} : memref<104x512xbf16, #tpu.memory_space<vmem>>, vector<8x256xbf16>,
    %c16_62 = arith.constant 16 : index
    %c143_63 = arith.constant 143 : index
    %110 = vector.load %arg6[%c16_62, %c143_63] : memref<104x512xbf16, #tpu.memory_space<vmem>>, vector<8x256xbf16>
    tpu.vector_store %arg6[%c16_62, %c143_63], %107 {strides = array<i32>} : memref<104x512xbf16, #tpu.memory_space<vmem>>, vector<8x256xbf16>,
    %c24_64 = arith.constant 24 : index
    %c129_65 = arith.constant 129 : index
    %111 = vector.load %arg6[%c24_64, %c129_65] : memref<104x512xbf16, #tpu.memory_space<vmem>>, vector<8x256xbf16>
    tpu.vector_store %arg6[%c24_64, %c129_65], %102 {strides = array<i32>} : memref<104x512xbf16, #tpu.memory_space<vmem>>, vector<8x256xbf16>,
    %c32_66 = arith.constant 32 : index
    %c128_67 = arith.constant 128 : index
    %112 = vector.load %arg6[%c32_66, %c128_67] : memref<104x512xbf16, #tpu.memory_space<vmem>>, vector<8x256xbf16>
    tpu.vector_store %arg6[%c32_66, %c128_67], %97 {strides = array<i32>} : memref<104x512xbf16, #tpu.memory_space<vmem>>, vector<8x256xbf16>,
    %c40_68 = arith.constant 40 : index
    %c127_69 = arith.constant 127 : index
    %113 = vector.load %arg6[%c40_68, %c127_69] : memref<104x512xbf16, #tpu.memory_space<vmem>>, vector<8x256xbf16>
    tpu.vector_store %arg6[%c40_68, %c127_69], %107 {strides = array<i32>} : memref<104x512xbf16, #tpu.memory_space<vmem>>, vector<8x256xbf16>,
    %c48_70 = arith.constant 48 : index
    %c113_71 = arith.constant 113 : index
    %114 = vector.load %arg6[%c48_70, %c113_71] : memref<104x512xbf16, #tpu.memory_space<vmem>>, vector<8x256xbf16>
    tpu.vector_store %arg6[%c48_70, %c113_71], %102 {strides = array<i32>} : memref<104x512xbf16, #tpu.memory_space<vmem>>, vector<8x256xbf16>,
    %c56_72 = arith.constant 56 : index
    %c112_73 = arith.constant 112 : index
    %115 = vector.load %arg6[%c56_72, %c112_73] : memref<104x512xbf16, #tpu.memory_space<vmem>>, vector<8x256xbf16>
    tpu.vector_store %arg6[%c56_72, %c112_73], %97 {strides = array<i32>} : memref<104x512xbf16, #tpu.memory_space<vmem>>, vector<8x256xbf16>,
    %c64_74 = arith.constant 64 : index
    %c111_75 = arith.constant 111 : index
    %116 = vector.load %arg6[%c64_74, %c111_75] : memref<104x512xbf16, #tpu.memory_space<vmem>>, vector<8x256xbf16>
    tpu.vector_store %arg6[%c64_74, %c111_75], %107 {strides = array<i32>} : memref<104x512xbf16, #tpu.memory_space<vmem>>, vector<8x256xbf16>,
    %c0_76 = arith.constant 0 : index
    %c128_77 = arith.constant 128 : index
    %117 = vector.load %arg6[%c0_76, %c128_77] : memref<104x512xbf16, #tpu.memory_space<vmem>>, vector<104x256xbf16>
    %c32_78 = arith.constant 32 : index
    %c0_79 = arith.constant 0 : index
    %118 = vector.load %arg4[%c32_78, %c0_79] : memref<64x104xbf16, #tpu.memory_space<vmem>>, vector<16x104xbf16>
    %cst_80 = arith.constant dense<0.000000e+00> : vector<16x256xf32>
    %119 = tpu.matmul %118, %117, %cst_80 {dimension_numbers = #tpu.dot_dimension_numbers<[1], [0], [0], [1], [0, 0, 1, 1], [], []>} : vector<16x104xbf16>, vector<104x256xbf16>, vector<16x256xf32> -> vector<16x256xf32>
    %120 = vector.extract_strided_slice %1 {offsets = [32, 0], sizes = [16, 256], strides = [1, 1]} : vector<64x256xf32> to vector<16x256xf32>
    %121 = arith.addf %119, %120 : vector<16x256xf32>
    %c0_81 = arith.constant 0 : index
    %c32_82 = arith.constant 32 : index
    %c0_83 = arith.constant 0 : index
    %122 = vector.load %arg5[%c0_81, %c32_82, %c0_83] : memref<1x64x256xf32, #tpu.memory_space<vmem>>, vector<1x16x256xf32>
    %123 = vector.shape_cast %122 : vector<1x16x256xf32> to vector<16x256xf32>
    %124 = vector.shape_cast %121 : vector<16x256xf32> to vector<1x16x256xf32>
    tpu.vector_store %arg5[%c0_81, %c32_82, %c0_83], %124 {strides = array<i32>} : memref<1x64x256xf32, #tpu.memory_space<vmem>>, vector<1x16x256xf32>,
    %125 = vector.extract_strided_slice %14 {offsets = [24, 0], sizes = [8, 256], strides = [1, 1]} : vector<32x256xbf16> to vector<8x256xbf16>
    %c0_i32_84 = arith.constant 0 : i32
    %126 = arith.sitofp %c0_i32_84 : i32 to bf16
    %127 = vector.shape_cast %40 : vector<1x256xi1> to vector<1x256xi1>
    %128 = vector.broadcast %127 : vector<1x256xi1> to vector<8x256xi1>
    %129 = vector.broadcast %126 : bf16 to vector<8x256xbf16>
    %130 = arith.select %128, %125, %129 : vector<8x256xi1>, vector<8x256xbf16>
    %c0_i32_85 = arith.constant 0 : i32
    %131 = arith.sitofp %c0_i32_85 : i32 to bf16
    %132 = vector.shape_cast %38 : vector<1x256xi1> to vector<1x256xi1>
    %133 = vector.broadcast %132 : vector<1x256xi1> to vector<8x256xi1>
    %134 = vector.broadcast %131 : bf16 to vector<8x256xbf16>
    %135 = arith.select %133, %125, %134 : vector<8x256xi1>, vector<8x256xbf16>
    %c0_86 = arith.constant 0 : index
    %c145_87 = arith.constant 145 : index
    %136 = vector.load %arg6[%c0_86, %c145_87] : memref<104x512xbf16, #tpu.memory_space<vmem>>, vector<8x256xbf16>
    tpu.vector_store %arg6[%c0_86, %c145_87], %130 {strides = array<i32>} : memref<104x512xbf16, #tpu.memory_space<vmem>>, vector<8x256xbf16>,
    %c8_88 = arith.constant 8 : index
    %c144_89 = arith.constant 144 : index
    %137 = vector.load %arg6[%c8_88, %c144_89] : memref<104x512xbf16, #tpu.memory_space<vmem>>, vector<8x256xbf16>
    tpu.vector_store %arg6[%c8_88, %c144_89], %125 {strides = array<i32>} : memref<104x512xbf16, #tpu.memory_space<vmem>>, vector<8x256xbf16>,
    %c16_90 = arith.constant 16 : index
    %c143_91 = arith.constant 143 : index
    %138 = vector.load %arg6[%c16_90, %c143_91] : memref<104x512xbf16, #tpu.memory_space<vmem>>, vector<8x256xbf16>
    tpu.vector_store %arg6[%c16_90, %c143_91], %135 {strides = array<i32>} : memref<104x512xbf16, #tpu.memory_space<vmem>>, vector<8x256xbf16>,
    %c24_92 = arith.constant 24 : index
    %c129_93 = arith.constant 129 : index
    %139 = vector.load %arg6[%c24_92, %c129_93] : memref<104x512xbf16, #tpu.memory_space<vmem>>, vector<8x256xbf16>
    tpu.vector_store %arg6[%c24_92, %c129_93], %130 {strides = array<i32>} : memref<104x512xbf16, #tpu.memory_space<vmem>>, vector<8x256xbf16>,
    %c32_94 = arith.constant 32 : index
    %c128_95 = arith.constant 128 : index
    %140 = vector.load %arg6[%c32_94, %c128_95] : memref<104x512xbf16, #tpu.memory_space<vmem>>, vector<8x256xbf16>
    tpu.vector_store %arg6[%c32_94, %c128_95], %125 {strides = array<i32>} : memref<104x512xbf16, #tpu.memory_space<vmem>>, vector<8x256xbf16>,
    %c40_96 = arith.constant 40 : index
    %c127_97 = arith.constant 127 : index
    %141 = vector.load %arg6[%c40_96, %c127_97] : memref<104x512xbf16, #tpu.memory_space<vmem>>, vector<8x256xbf16>
    tpu.vector_store %arg6[%c40_96, %c127_97], %135 {strides = array<i32>} : memref<104x512xbf16, #tpu.memory_space<vmem>>, vector<8x256xbf16>,
    %c48_98 = arith.constant 48 : index
    %c113_99 = arith.constant 113 : index
    %142 = vector.load %arg6[%c48_98, %c113_99] : memref<104x512xbf16, #tpu.memory_space<vmem>>, vector<8x256xbf16>
    tpu.vector_store %arg6[%c48_98, %c113_99], %130 {strides = array<i32>} : memref<104x512xbf16, #tpu.memory_space<vmem>>, vector<8x256xbf16>,
    %c56_100 = arith.constant 56 : index
    %c112_101 = arith.constant 112 : index
    %143 = vector.load %arg6[%c56_100, %c112_101] : memref<104x512xbf16, #tpu.memory_space<vmem>>, vector<8x256xbf16>
    tpu.vector_store %arg6[%c56_100, %c112_101], %125 {strides = array<i32>} : memref<104x512xbf16, #tpu.memory_space<vmem>>, vector<8x256xbf16>,
    %c64_102 = arith.constant 64 : index
    %c111_103 = arith.constant 111 : index
    %144 = vector.load %arg6[%c64_102, %c111_103] : memref<104x512xbf16, #tpu.memory_space<vmem>>, vector<8x256xbf16>
    tpu.vector_store %arg6[%c64_102, %c111_103], %135 {strides = array<i32>} : memref<104x512xbf16, #tpu.memory_space<vmem>>, vector<8x256xbf16>,
    %c0_104 = arith.constant 0 : index
    %c128_105 = arith.constant 128 : index
    %145 = vector.load %arg6[%c0_104, %c128_105] : memref<104x512xbf16, #tpu.memory_space<vmem>>, vector<104x256xbf16>
    %c48_106 = arith.constant 48 : index
    %c0_107 = arith.constant 0 : index
    %146 = vector.load %arg4[%c48_106, %c0_107] : memref<64x104xbf16, #tpu.memory_space<vmem>>, vector<16x104xbf16>
    %cst_108 = arith.constant dense<0.000000e+00> : vector<16x256xf32>
    %147 = tpu.matmul %146, %145, %cst_108 {dimension_numbers = #tpu.dot_dimension_numbers<[1], [0], [0], [1], [0, 0, 1, 1], [], []>} : vector<16x104xbf16>, vector<104x256xbf16>, vector<16x256xf32> -> vector<16x256xf32>
    %148 = vector.extract_strided_slice %1 {offsets = [48, 0], sizes = [16, 256], strides = [1, 1]} : vector<64x256xf32> to vector<16x256xf32>
    %149 = arith.addf %147, %148 : vector<16x256xf32>
    %c0_109 = arith.constant 0 : index
    %c48_110 = arith.constant 48 : index
    %c0_111 = arith.constant 0 : index
    %150 = vector.load %arg5[%c0_109, %c48_110, %c0_111] : memref<1x64x256xf32, #tpu.memory_space<vmem>>, vector<1x16x256xf32>
    %151 = vector.shape_cast %150 : vector<1x16x256xf32> to vector<16x256xf32>
    %152 = vector.shape_cast %149 : vector<16x256xf32> to vector<1x16x256xf32>
    tpu.vector_store %arg5[%c0_109, %c48_110, %c0_111], %152 {strides = array<i32>} : memref<1x64x256xf32, #tpu.memory_space<vmem>>, vector<1x16x256xf32>,
    return
  }
  func.func @transform_0(%arg0: i32) -> (i32, i32, i32) {
    %c0_i32 = arith.constant 0 : i32
    %c0_i32_0 = arith.constant 0 : i32
    %c0_i32_1 = arith.constant 0 : i32
    return %arg0, %c0_i32, %c0_i32_0 : i32, i32, i32
  }
  func.func @transform_1(%arg0: i32) -> (i32, i32) {
    %c0_i32 = arith.constant 0 : i32
    %c0_i32_0 = arith.constant 0 : i32
    %c0_i32_1 = arith.constant 0 : i32
    return %c0_i32, %c0_i32_0 : i32, i32
  }
  func.func @transform_2(%arg0: i32) -> (i32, i32) {
    %c0_i32 = arith.constant 0 : i32
    %c0_i32_0 = arith.constant 0 : i32
    %c0_i32_1 = arith.constant 0 : i32
    return %c0_i32, %c0_i32_0 : i32, i32
  }
  func.func @transform_3(%arg0: i32) -> (i32, i32) {
    %c0_i32 = arith.constant 0 : i32
    %c0_i32_0 = arith.constant 0 : i32
    %c0_i32_1 = arith.constant 0 : i32
    return %c0_i32, %c0_i32_0 : i32, i32
  }
  func.func @transform_4(%arg0: i32) -> (i32, i32, i32) {
    %c0_i32 = arith.constant 0 : i32
    %c0_i32_0 = arith.constant 0 : i32
    %c0_i32_1 = arith.constant 0 : i32
    return %arg0, %c0_i32, %c0_i32_0 : i32, i32, i32
  }
}

</mosaic_0001>

<bundles_post_ra>
// kernel: tpu_custom_call.1
= control target key start
LH: loop header
LB: loop body
LE: loop exit
PB: predicated region body
PF: predicated region fallthrough
CT: control target
= control target key end

     0   :  { %9 = vsyncpa [#allocation4], 0  ;;  %s2724_s0 = inlined_call_operand.hbm [shape: f32[2,64,256], index: 0, kind: input, shape index: {}]   ;;  %s2725_s1 = inlined_call_operand.hbm [shape: bf16[32,64], index: 1, kind: input, shape index: {}]   ;;  %s2726_s2 = inlined_call_operand.vmem [shape: f32[32,1], index: 2, kind: input, shape index: {}]   ;;  %s2727_s3 = inlined_call_operand.vmem [shape: bf16[64,104], index: 3, kind: input, shape index: {}]   ;;  %s2728_s4 = inlined_call_operand.hbm [shape: f32[2,64,256], index: 4, kind: output, shape index: {}]  }
   0x1   :  { %11 = vsyncpa [#allocation4 + $0x1], 0 }
   0x2   :  { %12 = vsyncpa [#allocation7], 0 }
   0x3   :  { %13 = vsyncpa [#allocation5], 0 }
   0x4   :  { %15 = vsyncpa [#allocation5 + $0x1], 0  ;;  %s2089_s15 = smov 0   ;;  %s2091_s16 = smov 0  }
   0x5   :  { %s2093_s17 = smov 0   ;;  %s2095_s18 = smov 0  }
   0x6 LB: > { %s2110_s19 = sadd.s32 4294967295, %s2047_s18   ;;  %s1488_s20 = sadd.s32 4294967294, %s2047_s18   ;;  %s2047_s18 = sphi %s2095_s18, %s2804_s18   ;;  %s2043_s17 = sphi %s2093_s17, %s2803_s17   ;;  %s2039_s16 = sphi %s2091_s16, %s2802_s16   ;;  %s2035_s15 = sphi %s2089_s15, %s2801_s15  }
   0x7   : > { %p41_p0 = scmp.ne.s32.totalorder %s2039_s16, %s2035_s15  ;;  %p42_p1 = scmp.eq.s32.totalorder %s2110_s19, 0 }
   0x8   : > { %p128_p2 = scmp.eq.s32.totalorder %s2110_s19, 1  ;;  %p134_p3 = scmp.eq.s32.totalorder %s1488_s20, 1 }
   0x9   : > { %p2119_p4 = por %p42_p1, %p41_p0  ;;  %p1489_p5 = scmp.ge.s32.totalorder %s2047_s18, 1 }
   0xa   : > { %p2124_p6 = por %p134_p3, %p41_p0  ;;  %p141_p7 = scmp.lt.s32.totalorder %s2047_s18, 3 }
   0xb   : > { %s152_s25 = sshll.u32 %s2725_s1, 4  ;;  %s2049_s27 = smov [#allocation6]   ;;  %s153_s25 = int_to_ptr.hbm [resolvable:$true] %s152_s25 }
   0xc   : > { %p2132_p8 = pnand %p1489_p5, %p141_p7  ;;  %s154_s28 = sshll.u32 %s2049_s27, 4  ;;  %s155_s28 = int_to_ptr.vmem [resolvable:$true] %s154_s28 }
   0xd   : > { %s2142_s29 = sadd.s32 1, %s2047_s18   ;;  %s2050_s30 = smov 64  }
   0xe   : > { %p1804_p9 = pneg %p2132_p8  ;;  %s2051_s5 = smov 4  }
   0xf   : > { %s25_s6 = ssub.s32 %s2047_s18, %s2142_s29  ;;  %s28_s7 = sadd.s32 1, %s2043_s17 }
  0x10   : > { %p1805_p10 = pnand %p1804_p9, %p42_p1  ;;  %p26_p12 = scmp.eq.s32.totalorder %s25_s6, 0 }
  0x11   : > { %p35_p13 = scmp.ne.s32.totalorder %s2043_s17, %s2039_s16  ;;  %p36_p0 = scmp.eq.s32.totalorder %s2047_s18, 0 }
  0x12   : > { %1807 = dma.hbm_to_vmem [thread:$0]  (!%p1805_p10), %s153_s25, 256, %s155_s28, [#allocation7], %s2050_s30, %s2050_s30, %s2051_s5  }
  0x13   : > { %p1817_p3 = scmp.lt.s32.totalorder %s2047_s18, 2  ;;  %p37_p5 = por %p36_p0, %p35_p13 }
  0x14   : > { %s2152_s8 = scalar_select %p26_p12, %s2043_s17, %s28_s7  }
  0x15   : > { %p2156_p7 = por %p128_p2, %p35_p13  ;;  %s174_s10 = sand.u32 1, %s2043_s17  }
  0x16   : > { %s1740_s11 = sshll.u32 %s2047_s18, 7  ;;  %s1492_s12 = sshll.u32 %s174_s10, 7 }
  0x17   : > { %s183_s20 = scalar_lea.hbm %s2724_s0, %s1740_s11  ;;  %s178_s24 = scalar_lea.vmem [#allocation3], %s1492_s12 }
  0x18   : > { %s184_s23 = sshll.u32 %s183_s20, 4  ;;  %s186_s25 = sshll.u32 %s178_s24, 4  ;;  %s185_s23 = int_to_ptr.hbm [resolvable:$true] %s184_s23  ;;  %s187_s25 = int_to_ptr.vmem [resolvable:$true] %s186_s25 }
  0x19   : > { %p2167_p9 = pnand %p1817_p3, %p37_p5  ;;  %s175_s28 = scalar_lea.sflag [#allocation4], %s174_s10 }
  0x1a   : > { %s1947_s30 = sshra.s32 %s185_s23, 4  ;;  %s1954_s11 = scalar_lea.hbm %s2724_s0, 256  ;;  %s1948_s30 = int_to_ptr.hbm [resolvable:$true] %s1947_s30 }
  0x1b   : > { %s1949_s5 = scalar_lea.hbm %s1948_s30, 128  ;;  %p1951_p10 = pneg %p2167_p9 }
  0x1c   : > { %p1950_p2 = scmp.ne.s32.totalorder %s1948_s30, %s1949_s5  ;;  %p1955_p0 = scmp.lt.s32.totalorder %s1948_s30, %s2724_s0 }
  0x1d   : > { %p1956_p3 = scmp.lt.s32.totalorder %s1954_s11, %s1949_s5 }
  0x1e   : > { %p1952_p12 = pnand %p1951_p10, %p1950_p2 }
  0x1f   : > { %p1957_p5 = por %p1956_p3, %p1955_p0 }
  0x20   : > { %p1953_p13 = pneg %p1952_p12 }
  0x22   : > { %p1958_p11 = pnand %p1957_p5, %p1953_p13 }
  0x24   : > { %1961 = shalt.err (!%p1958_p11)
}
  0x25   : > { %s2052_s10 = smov 256   ;;  %s2053_s14 = smov 16  }
  0x26   : > { %1811 = dma.hbm_to_vmem [thread:$0]  (!%p2167_p9), %s185_s23, 2048, %s187_s25, %s175_s28, %s2052_s10, %s2052_s10, %s2053_s14  }
  0x27   : > { %198 = sbr.rel (%p2132_p8) target bundleno = 574 (0x23e), region = 36  ;;  %s2184_s20 = sand.u32 (!%p2132_p8), 1, %s2039_s16  }
  0x28   : > { %s1496_s24 = sshll.u32 (!%p2132_p8), %s2184_s20, 7  ;;  %s201_s30 = scalar_lea.sflag (!%p2132_p8), [#allocation4], %s2184_s20 }
  0x29   : > { %s2190_s5 = scalar_lea.vmem (!%p2132_p8), [#allocation3], %s1496_s24 }
  0x2c   : > { %2022 = dma.done.wait (%p2119_p4), %s201_s30, 2048  }
  0x2d   : > { %2024 = vsyncadd (%p2119_p4), %s201_s30, 4294965248 }
  0x2e   : > { %2026 = dma.done.wait (%p42_p1), [#allocation7], 256  }
  0x2f   : > { %2028 = vsyncadd (%p42_p1), [#allocation7], 4294967040  ;;  %v2054_v0 = vmov 0   ;;  %v248_v1 = vld [vmem:[%s2190_s5 + $0x60] sm:$0xff]  ;;  %v250_v2 = vld [vmem:[%s2190_s5 + $0x70] sm:$0xff]  ;;  %vm298_vm0 = vcmask 523264   ;;  %v529_v40 = vlaneseq }
  0x30   : > { %1867 = vset.pattern.permute.xlu0 %v2054_v0  ;;  %507 = vst [vmem:[#allocation2 + $0x4] sm:$0xf] %v2054_v0  ;;  %1868 = vset.pattern.permute.xlu1 %v2054_v0  ;;  %v249_v3 = vld [vmem:[%s2190_s5 + $0x68] sm:$0xff]  ;;  %v258_v4 = vpack.c.bf16 %v250_v2, %v248_v1  ;;  %v251_v5 = vld [vmem:[%s2190_s5 + $0x78] sm:$0xff]  ;;  %v244_v6 = vld [vmem:[%s2190_s5 + $0x40] sm:$0xff]  ;;  %s2055_s11 = smov 16  }
  0x31   : > { %508 = vst [vmem:[#allocation2 + $0x14] sm:$0xf] %v2054_v0  ;;  %v246_v7 = vld [vmem:[%s2190_s5 + $0x50] sm:$0xff]  ;;  %v259_v8 = vpack.c.bf16 %v251_v5, %v249_v3  ;;  %v245_v9 = vld [vmem:[%s2190_s5 + $0x48] sm:$0xff]  ;;  %v247_v10 = vld [vmem:[%s2190_s5 + $0x58] sm:$0xff]  ;;  %v530_v49 = vand.u32 127, %v529_v40 }
  0x32   : > { %509 = vst [vmem:[#allocation2 + $0x24] sm:$0xf] %v2054_v0  ;;  %309 = vmatpush.bf16.msra.mxu0 %v258_v4  ;;  %v256_v11 = vpack.c.bf16 %v246_v7, %v244_v6  ;;  %v257_v12 = vpack.c.bf16 %v247_v10, %v245_v9  ;;  %v240_v13 = vld [vmem:[%s2190_s5 + $0x20] sm:$0xff]  ;;  %v242_v14 = vld [vmem:[%s2190_s5 + $0x30] sm:$0xff]  ;;  %v241_v15 = vld [vmem:[%s2190_s5 + $0x28] sm:$0xff]  ;;  %s2056_s12 = smov 112  }
  0x33   : > { %510 = vst [vmem:[#allocation2 + $0x34] sm:$0xf] %v2054_v0  ;;  %328 = vmatpush.bf16.msra.mxu1 %v259_v8  ;;  %v243_v16 = vld [vmem:[%s2190_s5 + $0x38] sm:$0xff]  ;;  %v264_v17 = vld [vmem:[%s2726_s2] sm:$0xff]  ;;  %v266_v18 = vld [vmem:[%s2726_s2 + $0x10] sm:$0xff]  ;;  %v254_v19 = vpack.c.bf16 %v242_v14, %v240_v13  ;;  %v2240_v53 = vadd.s32 128, %v530_v49 }
  0x34   : > { %511 = vst [vmem:[#allocation2 + $0x44] sm:$0xf] %v2054_v0  ;;  %270 = vperm.xlu0 %1867, %v264_v17   ;;  %280 = vperm.xlu1 %1868, %v266_v18   ;;  %v255_v20 = vpack.c.bf16 %v243_v16, %v241_v15  ;;  %v236_v21 = vld [vmem:[%s2190_s5] sm:$0xff]  ;;  %v238_v22 = vld [vmem:[%s2190_s5 + $0x10] sm:$0xff]  ;;  %v237_v23 = vld [vmem:[%s2190_s5 + $0x8] sm:$0xff]  ;;  %v536_v57 = vand.u32 15, %v530_v49 }
  0x35   : > { %512 = vst [vmem:[#allocation2 + $0x54] sm:$0xf] %v2054_v0  ;;  %v239_v24 = vld [vmem:[%s2190_s5 + $0x18] sm:$0xff]  ;;  %v252_v25 = vpack.c.bf16 %v238_v22, %v236_v21  ;;  %v267_v28 = vld [vmem:[%s2726_s2 + $0x18] sm:$0xff]  ;;  %v1741_v29 = vld [vmem:[#allocation6] sm:$0xff]  ;;  %v543_v63 = vand.u32 15, %v2240_v53 }
  0x36   : > { %513 = vst [vmem:[#allocation2 + $0x64] sm:$0xf] %v2054_v0  ;;  %310 = vmatpush.bf16.msra.mxu0 %v256_v11  ;;  %v265_v26 = vld [vmem:[%s2726_s2 + $0x8] sm:$0xff]  ;;  %v253_v27 = vpack.c.bf16 %v239_v24, %v237_v23  ;;  %v1742_v30 = vld [vmem:[#allocation6 + $0x8] sm:$0xff]  ;;  %vm2252_vm1 = vcmp.ne.s32.totalorder %v536_v57, 0  ;;  %vm2280_vm11 = vcmp.ne.s32.totalorder %v536_v57, 15 }
  0x37   : > { %514 = vst [vmem:[#allocation2 + $0x74] sm:$0xf] %v2054_v0  ;;  %329 = vmatpush.bf16.msra.mxu1 %v257_v12  ;;  %vm2258_vm2 = vcmp.ne.s32.totalorder %v543_v63, 0  ;;  %vm2292_vm12 = vcmp.ne.s32.totalorder %v543_v63, 15  ;;  %s2057_s13 = smov 127   ;;  %s2058_s10 = smov 15  }
  0x38   : > { %515 = vst [vmem:[#allocation2 + $0x84] sm:$0xf] %v2054_v0  ;;  %s2059_s14 = smov 111   ;;  %s2060_s30 = smov 1  }
  0x39   : > { %516 = vst [vmem:[#allocation2 + $0x8] sm:$0xf] %v2054_v0  ;;  %s2061_s21 = smov 113   ;;  %s2062_s26 = smov 17  }
  0x3a   : > { %517 = vst [vmem:[#allocation2 + $0x18] sm:$0xf] %v2054_v0  ;;  %311 = vmatpush.bf16.msra.mxu0 %v254_v19  ;;  %s1997_s7 = scalar_lea.hbm %s2728_s4, 256 }
  0x3b   : > { %518 = vst [vmem:[#allocation2 + $0x28] sm:$0xf] %v2054_v0  ;;  %330 = vmatpush.bf16.msra.mxu1 %v255_v20 }
  0x3c   : > { %519 = vst [vmem:[#allocation2 + $0x38] sm:$0xf] %v2054_v0  ;;  %275 = vperm.xlu0 %1867, %v265_v26   ;;  %285 = vperm.xlu1 %1868, %v267_v28  }
  0x3d   : > { %520 = vst [vmem:[#allocation2 + $0x48] sm:$0xf] %v2054_v0 }
  0x3e   : > { %521 = vst [vmem:[#allocation2 + $0x58] sm:$0xf] %v2054_v0  ;;  %312 = vmatpush.bf16.msra.mxu0 %v252_v25 }
  0x3f   : > { %522 = vst [vmem:[#allocation2 + $0x68] sm:$0xf] %v2054_v0  ;;  %331 = vmatpush.bf16.msra.mxu1 %v253_v27 }
  0x40   : > { %523 = vst [vmem:[#allocation2 + $0x78] sm:$0xf] %v2054_v0 }
  0x41   : > { %524 = vst [vmem:[#allocation2 + $0x88] sm:$0xf] %v2054_v0  ;;  %1507 = vmatmul.msk.bf16.vlgmr.msra.gmra.mxu0 %vm298_vm0, %v1741_v29 }
  0x42   : > { %1509 = vmatmul.msk.bf16.vlgmr.msra.gmra.mxu1 %vm298_vm0, %v1741_v29 }
  0x51   : > { %1508 = vmatmul.msk.bf16.gmra.mxu0 %vm298_vm0, %v1742_v30 }
  0x52   : > { %1510 = vmatmul.msk.bf16.gmra.mxu1 %vm298_vm0, %v1742_v30  ;;  %vm2309_vm0 = vmpackc.low %vm2258_vm2, %vm2252_vm1 }
  0xa6   : > { %v271_v31 = vpop.permute.xlu0 %270  ;;  %v281_v51 = vpop.permute.xlu1 %280 }
  0xae   : > { %v276_v38 = vpop.permute.xlu0 %275  ;;  %v286_v12 = vpop.permute.xlu1 %285 }
  0xbe   : > { %v314_v32 = vpop.f32.mrf.mxu0 }
  0xbf   : > { %v2228_v33 = vadd.f32 %v314_v32, %v271_v31  ;;  %v333_v34 = vpop.f32.mrf.mxu1 }
  0xc0   : > { %v2230_v35 = vadd.f32 %v333_v34, %v271_v31 }
  0xc1   : > { %v1511_v36 = vmul.f32 -1.442695, %v2228_v33 }
  0xc2   : > { %v1512_v37 = vmul.f32 -1.442695, %v2230_v35 }
  0xc3   : > { %1869 = vpow2.f32 %v1511_v36 }
  0xc4   : > { %1871 = vpow2.f32 %v1512_v37 }
  0xc6   : > { %v316_v39 = vpop.f32.mrf.mxu0 }
  0xc7   : > { %v2234_v41 = vadd.f32 %v316_v39, %v276_v38  ;;  %v335_v42 = vpop.f32.mrf.mxu1 }
  0xc8   : > { %v2236_v43 = vadd.f32 %v335_v42, %v276_v38 }
  0xc9   : > { %v1870_v44 = vpop.eup %1869  ;;  %v1513_v45 = vmul.f32 -1.442695, %v2234_v41 }
  0xca   : > { %v1872_v46 = vpop.eup %1871  ;;  %v367_v47 = vadd.f32 1.0, %v1870_v44  ;;  %v1514_v48 = vmul.f32 -1.442695, %v2236_v43 }
  0xcb   : > { %v368_v50 = vadd.f32 1.0, %v1872_v46  ;;  %1873 = vpow2.f32 %v1513_v45 }
  0xcc   : > { %1875 = vrcp.f32 %v367_v47  ;;  %v384_v3 = vand.u32 2147483647, %v367_v47  ;;  %v386_v7 = vand.u32 2147483648, %v367_v47  ;;  %vm380_vm3 = vweird.f32 %v367_v47 }
  0xcd   : > { %1877 = vrcp.f32 %v368_v50  ;;  %v399_v8 = vand.u32 2147483647, %v368_v50  ;;  %v401_v11 = vand.u32 2147483648, %v368_v50  ;;  %vm395_vm6 = vweird.f32 %v368_v50 }
  0xce   : > { %1879 = vpow2.f32 %v1514_v48  ;;  %v319_v52 = vpop.f32.mrf.mxu0  ;;  %vm2263_vm5 = vcmp.eq.f32.partialorder %v384_v3, 8.507059e+37  ;;  %v387_v20 = vor.u32 1.1754944e-38, %v386_v7 }
  0xcf   : > { %v2242_v54 = vadd.f32 %v319_v52, %v281_v51  ;;  %v338_v55 = vpop.f32.mrf.mxu1  ;;  %vm2267_vm8 = vcmp.eq.f32.partialorder %v399_v8, 8.507059e+37  ;;  %v402_v26 = vor.u32 1.1754944e-38, %v401_v11 }
  0xd0   : > { %v2244_v56 = vadd.f32 %v338_v55, %v281_v51 }
  0xd1   : > { %v1874_v58 = vpop.eup %1873  ;;  %v1515_v59 = vmul.f32 -1.442695, %v2242_v54 }
  0xd2   : > { %v1876_v60 = vpop.eup %1875  ;;  %v2247_v61 = vadd.f32 1.0, %v1874_v58  ;;  %v1516_v62 = vmul.f32 -1.442695, %v2244_v56 }
  0xd3   : > { %v1878_v0 = vpop.eup %1877  ;;  %v376_v1 = vmul.f32 %v1876_v60, %v367_v47  ;;  %1881 = vpow2.f32 %v1515_v59  ;;  %vm381_vm4 = vweird.f32 %v1876_v60 }
  0xd4   : > { %v1880_v2 = vpop.eup %1879  ;;  %v391_v4 = vmul.f32 %v1878_v0, %v368_v50  ;;  %1883 = vrcp.f32 %v2247_v61  ;;  %vm396_vm7 = vweird.f32 %v1878_v0  ;;  %vm382_vm9 = vmor %vm380_vm3, %vm381_vm4  ;;  %v414_v27 = vand.u32 2147483647, %v2247_v61 }
  0xd5   : > { %v377_v6 = vsub.f32 1.0, %v376_v1  ;;  %v2256_v9 = vadd.f32 1.0, %v1880_v2  ;;  %1885 = vpow2.f32 %v1516_v62  ;;  %vm397_vm10 = vmor %vm395_vm6, %vm396_vm7  ;;  %v416_v31 = vand.u32 2147483648, %v2247_v61 }
  0xd6   : > { %v392_v10 = vsub.f32 1.0, %v391_v4  ;;  %v321_v13 = vpop.f32.mrf.mxu0  ;;  %vm410_vm13 = vweird.f32 %v2247_v61  ;;  %vm2298_vm14 = vcmp.eq.f32.partialorder %v414_v27, 8.507059e+37 }
  0xd7   : > { %v378_v15 = vmul.f32 %v1876_v60, %v377_v6  ;;  %1887 = vrcp.f32 %v2256_v9  ;;  %v2271_v22 = vadd.f32 %v321_v13, %v286_v12  ;;  %v340_v23 = vpop.f32.mrf.mxu1  ;;  %v417_v52 = vor.u32 1.1754944e-38, %v416_v31 }
  0xd8   : > { %v393_v17 = vmul.f32 %v1878_v0, %v392_v10  ;;  %v2287_v39 = vadd.f32 %v340_v23, %v286_v12  ;;  %v429_v58 = vand.u32 2147483647, %v2256_v9  ;;  %v431_v59 = vand.u32 2147483648, %v2256_v9 }
  0xd9   : > { %v1882_v18 = vpop.eup %1881  ;;  %v379_v19 = vadd.f32 %v1876_v60, %v378_v15  ;;  %v1517_v32 = vmul.f32 -1.442695, %v2271_v22  ;;  %vm425_vm3 = vweird.f32 %v2256_v9 }
  0xda   : > { %v1884_v24 = vpop.eup %1883  ;;  %v394_v25 = vadd.f32 %v1878_v0, %v393_v17  ;;  %v2274_v28 = vadd.f32 1.0, %v1882_v18  ;;  %v1518_v55 = vmul.f32 -1.442695, %v2287_v39  ;;  %v432_v7 = vor.u32 1.1754944e-38, %v431_v59 }
  0xdb   : > { %v383_v29 = vsel %vm382_vm9, %v1876_v60, %v379_v19  ;;  %v406_v30 = vmul.f32 %v1884_v24, %v2247_v61  ;;  %v1886_v36 = vpop.eup %1885  ;;  %vm411_vm15 = vweird.f32 %v1884_v24  ;;  %vm430_vm7 = vcmp.eq.f32.partialorder %v429_v58, 8.507059e+37 }
  0xdc   : > { %v388_v37 = vsel %vm2263_vm5, %v387_v20, %v383_v29  ;;  %v398_v38 = vsel %vm397_vm10, %v1878_v0, %v394_v25  ;;  %1889 = vrcp.f32 %v2274_v28  ;;  %vm2321_vm1 = vmor %vm410_vm13, %vm411_vm15  ;;  %v444_v2 = vand.u32 2147483647, %v2274_v28 }
  0xdd   : > { %v1888_v40 = vpop.eup %1887  ;;  %v495_v42 = vmul.f32 %v388_v37, %v2228_v33  ;;  %v403_v44 = vsel %vm2267_vm8, %v402_v26, %v398_v38  ;;  %v407_v45 = vsub.f32 1.0, %v406_v30  ;;  %v2303_v33 = vadd.f32 1.0, %v1886_v36  ;;  %vm2349_vm8 = vmpackc.low %vm2292_vm12, %vm2280_vm11 }
  0xde   : > { %v496_v47 = vmul.f32 %v403_v44, %v2230_v35  ;;  %v421_v49 = vmul.f32 %v1888_v40, %v2256_v9  ;;  %1891 = vpow2.f32 %v1517_v32  ;;  %vm426_vm2 = vweird.f32 %v1888_v40 }
  0xdf   : > { %v408_v50 = vmul.f32 %v1884_v24, %v407_v45  ;;  %1893 = vrcp.f32 %v2303_v33  ;;  %v446_v3 = vand.u32 2147483648, %v2274_v28  ;;  %vm427_vm4 = vmor %vm425_vm3, %vm426_vm2  ;;  %vm440_vm5 = vweird.f32 %v2274_v28 }
  0xe0   : > { %v503_v35 = vpack.c.bf16 %v496_v47, %v495_v42  ;;  %v422_v53 = vsub.f32 1.0, %v421_v49  ;;  %1895 = vpow2.f32 %v1518_v55  ;;  %vm2354_vm9 = vcmp.eq.f32.partialorder %v444_v2, 8.507059e+37 }
  0xe1   : > { %v409_v57 = vadd.f32 %v1884_v24, %v408_v50  ;;  %vm455_vm11 = vweird.f32 %v2303_v33  ;;  %v459_v23 = vand.u32 2147483647, %v2303_v33 }
  0xe2   : > { %v2317_v60 = vpop.eup %1889  ;;  %525 = vst [vmem:[#allocation2 + $0x94] sm:$0xff] %v503_v35  ;;  %v423_v63 = vmul.f32 %v1888_v40, %v422_v53  ;;  %587 = vrot.lane.b32.xlu2 %v503_v35, %s2055_s11  ;;  %649 = vrot.lane.b32.xlu0 %v503_v35, %s2056_s12  ;;  %v571_v0 = vsel %vm2309_vm0, %v503_v35, 0  ;;  %v565_v25 = vsel %vm2349_vm8, %v503_v35, 0 }
  0xe3   : > { %624 = vst [vmem:[#allocation2 + $0x44] sm:$0xff] %v503_v35  ;;  %v413_v61 = vsel %vm2321_vm1, %v1884_v24, %v409_v57  ;;  %v436_v1 = vmul.f32 %v2317_v60, %v2274_v28  ;;  %625 = vrot.lane.b32.xlu1 %v571_v0, %s2057_s13  ;;  %vm441_vm6 = vweird.f32 %v2317_v60  ;;  %v461_v24 = vand.u32 2147483648, %v2303_v33 }
  0xe4   : > { %v418_v4 = vsel %vm2298_vm14, %v417_v52, %v413_v61  ;;  %v424_v5 = vadd.f32 %v1888_v40, %v423_v63  ;;  %v1892_v6 = vpop.eup %1891  ;;  %vm2359_vm10 = vmor %vm440_vm5, %vm441_vm6  ;;  %vm460_vm14 = vcmp.eq.f32.partialorder %v459_v23, 8.507059e+37 }
  0xe5   : > { %v437_v8 = vsub.f32 1.0, %v436_v1  ;;  %v497_v10 = vmul.f32 %v418_v4, %v2234_v41  ;;  %v2343_v12 = vadd.f32 1.0, %v1892_v6  ;;  %v1894_v13 = vpop.eup %1893  ;;  %v447_v41 = vor.u32 1.1754944e-38, %v446_v3 }
  0xe6   : > { %v428_v11 = vsel %vm427_vm4, %v1888_v40, %v424_v5  ;;  %v1896_v17 = vpop.eup %1895  ;;  %v451_v20 = vmul.f32 %v1894_v13, %v2303_v33  ;;  %vm456_vm12 = vweird.f32 %v1894_v13  ;;  %v462_v34 = vor.u32 1.1754944e-38, %v461_v24 }
  0xe7   : > { %v433_v14 = vsel %vm430_vm7, %v432_v7, %v428_v11  ;;  %v438_v15 = vmul.f32 %v2317_v60, %v437_v8  ;;  %1897 = vrcp.f32 %v2343_v12  ;;  %v2373_v27 = vadd.f32 1.0, %v1896_v17  ;;  %vm457_vm13 = vmor %vm455_vm11, %vm456_vm12 }
  0xe8   : > { %v498_v18 = vmul.f32 %v433_v14, %v2236_v43  ;;  %v452_v26 = vsub.f32 1.0, %v451_v20  ;;  %v476_v44 = vand.u32 2147483648, %v2343_v12  ;;  %v474_v49 = vand.u32 2147483647, %v2343_v12 }
  0xe9   : > { %v439_v21 = vadd.f32 %v2317_v60, %v438_v15  ;;  %1899 = vrcp.f32 %v2373_v27  ;;  %vm470_vm15 = vweird.f32 %v2343_v12  ;;  %v491_v35 = vand.u32 2147483648, %v2373_v27 }
  0xea   : > { %v2371_v43 = vpack.c.bf16 %v498_v18, %v497_v10  ;;  %600 = vrot.lane.b32.xlu0 %v571_v0, %s2058_s10  ;;  %661 = vrot.lane.b32.xlu2 %v571_v0, %s2059_s14  ;;  %v2381_v29 = vld [vmem:[#allocation2 + $0x48] sm:$0xf]  ;;  %v453_v30 = vmul.f32 %v1894_v13, %v452_v26  ;;  %v2385_v31 = vld [vmem:[#allocation2 + $0x44] sm:$0xf]  ;;  %vm475_vm3 = vcmp.eq.f32.partialorder %v474_v49, 8.507059e+37  ;;  %vm485_vm4 = vweird.f32 %v2373_v27 }
  0xeb   : > { %v443_v28 = vsel %vm2359_vm10, %v2317_v60, %v439_v21  ;;  %612 = vrot.lane.b32.xlu1 %v565_v25, %s2060_s30  ;;  %v489_v60 = vand.u32 2147483647, %v2373_v27  ;;  %v492_v63 = vor.u32 1.1754944e-38, %v491_v35  ;;  %vm594_vm10 = vcmask 1043584  }
  0xec   : > { %526 = vst [vmem:[#allocation2 + $0xa4] sm:$0xff] %v2371_v43  ;;  %v448_v32 = vsel %vm2354_vm9, %v447_v41, %v443_v28  ;;  %v454_v37 = vadd.f32 %v1894_v13, %v453_v30  ;;  %v802_v61 = vsel %vm2309_vm0, %v2371_v43, 0  ;;  %v801_v8 = vsel %vm2349_vm8, %v2371_v43, 0 }
  0xed   : > { %838 = vst [vmem:[#allocation2 + $0x44] sm:$0xff] %v2371_v43  ;;  %v1898_v36 = vpop.eup %1897  ;;  %v499_v40 = vmul.f32 %v448_v32, %v2242_v54  ;;  %vm490_vm7 = vcmp.eq.f32.partialorder %v489_v60, 8.507059e+37  ;;  %vm762_vm9 = vcmask 1043456   ;;  %vm2729_vm11 = vcmask 130048  }
  0xee   : > { %v466_v38 = vmul.f32 %v1898_v36, %v2343_v12  ;;  %v458_v42 = vsel %vm457_vm13, %v1894_v13, %v454_v37  ;;  %vm471_vm1 = vweird.f32 %v1898_v36  ;;  %vm668_vm12 = vcmask 1044344  }
  0xef   : > { %v463_v45 = vsel %vm460_vm14, %v462_v34, %v458_v42  ;;  %v1900_v47 = vpop.eup %1899  ;;  %vm472_vm2 = vmor %vm470_vm15, %vm471_vm1  ;;  %vm2730_vm13 = vcmask 908288   ;;  %vm2733_vm14 = vcmask 904192   ;;  %vm644_vm1 = vcmask 1044360  }
  0xf0   : > { %v467_v46 = vsub.f32 1.0, %v466_v38  ;;  %v500_v48 = vmul.f32 %v463_v45, %v2244_v56  ;;  %v481_v54 = vmul.f32 %v1900_v47, %v2373_v27  ;;  %v477_v56 = vor.u32 1.1754944e-38, %v476_v44 }
  0xf1   : > { %vm486_vm5 = vweird.f32 %v1900_v47 }
  0xf2   : > { %855 = vrot.lane.b32.xlu0 %v2371_v43, %s2056_s12  ;;  %637 = vrot.lane.b32.xlu2 %v565_v25, %s2061_s21  ;;  %v468_v50 = vmul.f32 %v1898_v36, %v467_v46  ;;  %v2404_v33 = vpack.c.bf16 %v500_v48, %v499_v40  ;;  %v482_v53 = vsub.f32 1.0, %v481_v54  ;;  %vm487_vm6 = vmor %vm485_vm4, %vm486_vm5  ;;  %v1559_v46 = vld [vmem:[#allocation2 + $0x94] sm:$0xf0]  ;;  %vm656_vm5 = vcmask 1044352  }
  0xf3   : > { %573 = vrot.lane.b32.xlu1 %v565_v25, %s2062_s26  ;;  %v1565_v18 = vld [vmem:[#allocation2 + $0xa4] sm:$0xf]  ;;  %v1753_v19 = vld [vmem:[#allocation2 + $0xa8] sm:$0xf] }
  0xf4   : > { %v469_v52 = vadd.f32 %v1898_v36, %v468_v50  ;;  %v2407_v55 = vld [vmem:[#allocation2 + $0x48] sm:$0xf]  ;;  %527 = vst [vmem:[#allocation2 + $0xb4] sm:$0xff] %v2404_v33  ;;  %v2411_v57 = vld [vmem:[#allocation2 + $0x44] sm:$0xf]  ;;  %v483_v59 = vmul.f32 %v1900_v47, %v482_v53  ;;  %v997_v26 = vsel %vm2349_vm8, %v2404_v33, 0 }
  0xf5   : > { %1034 = vst [vmem:[#allocation2 + $0x44] sm:$0xff] %v2404_v33  ;;  %v1619_v23 = vld [vmem:[#allocation2 + $0xa4] sm:$0xf]  ;;  %v1766_v24 = vld [vmem:[#allocation2 + $0xa8] sm:$0xf] }
  0xf6   : > { %v473_v58 = vsel %vm472_vm2, %v1898_v36, %v469_v52  ;;  %v484_v0 = vadd.f32 %v1900_v47, %v483_v59  ;;  %vm2735_vm2 = vcmask 924672   ;;  %v1752_v50 = vld [vmem:[#allocation2 + $0x90] sm:$0xf0] }
  0xf7   : > { %v478_v62 = vsel %vm475_vm3, %v477_v56, %v473_v58  ;;  %vm2734_vm3 = vcmask 920576  }
  0xf8   : > { %v501_v1 = vmul.f32 %v478_v62, %v2271_v22  ;;  %v488_v2 = vsel %vm487_vm6, %v1900_v47, %v484_v0  ;;  %v998_v22 = vsel %vm2309_vm0, %v2404_v33, 0  ;;  %vm2736_vm6 = vcmask 916480  }
  0xf9   : > { %v493_v3 = vsel %vm490_vm7, %v492_v63, %v488_v2  ;;  %vm2731_vm7 = vcmask 912384  }
  0xfa   : > { %839 = vrot.lane.b32.xlu0 %v802_v61, %s2057_s13  ;;  %863 = vrot.lane.b32.xlu2 %v802_v61, %s2059_s14  ;;  %v502_v4 = vmul.f32 %v493_v3, %v2287_v39 }
  0xfb   : > { %813 = vrot.lane.b32.xlu1 %v2371_v43, %s2055_s11  ;;  %v1754_v15 = vld [vmem:[#allocation2 + $0xb0] sm:$0xf0]  ;;  %v1567_v16 = vld [vmem:[#allocation2 + $0xb4] sm:$0xf0] }
  0xfc   : > { %v506_v5 = vpack.c.bf16 %v502_v4, %v501_v1  ;;  %v2424_v6 = vld [vmem:[#allocation2 + $0x48] sm:$0xf]  ;;  %v2426_v7 = vld [vmem:[#allocation2 + $0x44] sm:$0xf]  ;;  %v1767_v41 = vld [vmem:[#allocation2 + $0xb0] sm:$0xf0]  ;;  %v1566_v20 = vor.u32 %v1754_v15, %v1565_v18  ;;  %v1570_v21 = vor.u32 %v1753_v19, %v1567_v16 }
  0xfd   : > { %v1621_v17 = vld [vmem:[#allocation2 + $0xb4] sm:$0xf0]  ;;  %v1620_v25 = vor.u32 %v1767_v41, %v1619_v23  ;;  %v1765_v19 = vld [vmem:[#allocation2 + $0x90] sm:$0xf0] }
  0xfe   : > { %v730_v10 = vunpack.c.l.b16 %v506_v5  ;;  %v731_v11 = vunpack.c.h.b16 %v506_v5  ;;  %1230 = vst [vmem:[#allocation2 + $0x44] sm:$0xff] %v506_v5  ;;  %v1624_v43 = vor.u32 %v1766_v24, %v1621_v17  ;;  %v1194_v27 = vsel %vm2309_vm0, %v506_v5, 0  ;;  %v1613_v23 = vld [vmem:[#allocation2 + $0x94] sm:$0xf0] }
  0xff   : > { %v1193_v28 = vsel %vm2349_vm8, %v506_v5, 0  ;;  %vm581_vm0 = vcmask 1047556  }
 0x100   : > { %v744_v39 = vpack.c.b16 %v730_v10, %v730_v10  ;;  %v745_v12 = vpack.c.b16 %v731_v11, %v731_v11  ;;  %vm2472_vm8 = vmor %vm581_vm0, %vm594_vm10  ;;  %vm2732_vm10 = vcmask 1039360  }
 0x101   : > { %vm2480_vm15 = vmor %vm581_vm0, %vm668_vm12  ;;  %vm632_vm12 = vcmask 1044472  }
 0x102   : > { %830 = vrot.lane.b32.xlu0 %v801_v8, %s2060_s30  ;;  %847 = vrot.lane.b32.xlu2 %v801_v8, %s2061_s21  ;;  %v2437_v13 = vsel %vm762_vm9, %v744_v39, 0  ;;  %v2439_v14 = vsel %vm762_vm9, %v745_v12, 0  ;;  %vm2489_vm4 = vmor %vm581_vm0, %vm644_vm1 }
 0x103   : > { %1059 = vrot.lane.b32.xlu1 %v998_v22, %s2059_s14  ;;  %770 = vmatpush.bf16.msra.mxu2 %v2437_v13  ;;  %vm2498_vm9 = vmor %vm581_vm0, %vm656_vm5  ;;  %vm635_vm5 = vcmask 1035264  }
 0x104   : > { %784 = vmatpush.bf16.msra.mxu3 %v2439_v14  ;;  %966 = vmatpush.bf16.msrb.mxu0 %v2437_v13  ;;  %vm2508_vm1 = vmor %vm581_vm0, %vm632_vm12 }
 0x105   : > { %980 = vmatpush.bf16.msrb.mxu1 %v2439_v14 }
 0x107   : > { %771 = vmatpush.bf16.msra.mxu2 %v1566_v20 }
 0x108   : > { %785 = vmatpush.bf16.msra.mxu3 %v1570_v21  ;;  %967 = vmatpush.bf16.msrb.mxu0 %v1620_v25 }
 0x109   : > { %981 = vmatpush.bf16.msrb.mxu1 %v1624_v43 }
 0x10a   : > { %804 = vrot.lane.b32.xlu0 %v801_v8, %s2062_s26  ;;  %822 = vrot.lane.b32.xlu2 %v802_v61, %s2058_s10 }
 0x10b   : > { %1043 = vrot.lane.b32.xlu1 %v997_v26, %s2061_s21 }
 0x112   : > { %1009 = vrot.lane.b32.xlu0 %v2404_v33, %s2055_s11  ;;  %1051 = vrot.lane.b32.xlu2 %v2404_v33, %s2056_s12 }
 0x113   : > { %1018 = vrot.lane.b32.xlu1 %v998_v22, %s2058_s10 }
 0x11a   : > { %1255 = vrot.lane.b32.xlu0 %v1194_v27, %s2059_s14  ;;  %1035 = vrot.lane.b32.xlu2 %v998_v22, %s2057_s13 }
 0x11b   : > { %1247 = vrot.lane.b32.xlu1 %v506_v5, %s2056_s12 }
 0x122   : > { %1239 = vrot.lane.b32.xlu0 %v1193_v28, %s2061_s21  ;;  %1026 = vrot.lane.b32.xlu2 %v997_v26, %s2060_s30 }
 0x123   : > { %1231 = vrot.lane.b32.xlu1 %v1194_v27, %s2057_s13 }
 0x12a   : > { %1222 = vrot.lane.b32.xlu0 %v1193_v28, %s2060_s30  ;;  %1000 = vrot.lane.b32.xlu2 %v997_v26, %s2062_s26 }
 0x12b   : > { %1196 = vrot.lane.b32.xlu1 %v1193_v28, %s2062_s26 }
 0x132   : > { %1214 = vrot.lane.b32.xlu2 %v1194_v27, %s2058_s10  ;;  %s2657_s10 = scalar_lea.vmem [#allocation8], %s1496_s24  ;;  %s1795_s24 = sshll.u32 %s2110_s19, 7 }
 0x133   : > { %s1401_s21 = scalar_lea.hbm %s2728_s4, %s1795_s24  ;;  %s1402_s26 = sshll.u32 %s2657_s10, 4  ;;  %s1403_s26 = int_to_ptr.vmem [resolvable:$true] %s1402_s26 }
 0x134   : > { %s1404_s23 = sshll.u32 %s1401_s21, 4  ;;  %s1390_s19 = scalar_lea.sflag [#allocation5], %s2184_s20  ;;  %s1405_s23 = int_to_ptr.hbm [resolvable:$true] %s1404_s23 }
 0x135   : > { %s1991_s25 = sshra.s32 %s1405_s23, 4  ;;  %s1992_s25 = int_to_ptr.hbm [resolvable:$true] %s1991_s25 }
 0x136   : > { %s1993_s27 = scalar_lea.hbm %s1992_s25, 128  ;;  %p1998_p11 = scmp.lt.s32.totalorder %s1992_s25, %s2728_s4 }
 0x137   : > { %p1994_p1 = scmp.ne.s32.totalorder %s1992_s25, %s1993_s27  ;;  %p1999_p9 = scmp.lt.s32.totalorder %s1997_s7, %s1993_s27 }
 0x139   : > { %p1995_p4 = pnand %p1994_p1, %p2156_p7  ;;  %p2000_p2 = por %p1999_p9, %p1998_p11 }
 0x13a   : > { %1205 = vrot.lane.b32.xlu2 %v506_v5, %s2055_s11 }
 0x13b   : > { %p1996_p8 = pneg %p1995_p4 }
 0x13c   : > { %v588_v51 = vpop.permute.xlu2 %587 }
 0x13d   : > { %v589_v30 = vrot.slane %v588_v51, 4  ;;  %p2001_p10 = pnand %p2000_p2, %p1996_p8 }
 0x13f   : > { %v591_v32 = vsel %vm2729_vm11, %v589_v30, %v588_v51  ;;  %vm607_vm11 = vcmask 1043576  }
 0x140   : > { %596 = vst.msk [vmem:[#allocation2 + $0x14] sm:$0xff] %vm2472_vm8, %v591_v32  ;;  %vm2520_vm12 = vmor %vm581_vm0, %vm607_vm11  ;;  %vm580_vm11 = vcmask 1043592  }
 0x144   : > { %v662_v34 = vpop.permute.xlu2 %661 }
 0x145   : > { %v663_v37 = vrot.slane %v662_v34, 4 }
 0x147   : > { %v665_v38 = vsel %vm2730_vm13, %v663_v37, %v662_v34  ;;  %672 = vst.msk [vmem:[#allocation2 + $0x88] sm:$0xf] %vm2733_vm14, %v663_v37 }
 0x148   : > { %670 = vst.msk [vmem:[#allocation2 + $0x80] sm:$0xff] %vm2480_vm15, %v665_v38 }
 0x14c   : > { %v638_v40 = vpop.permute.xlu2 %637 }
 0x14d   : > { %v639_v44 = vrot.slane %v638_v40, 4 }
 0x14e   : > { %v1751_v45 = vld [vmem:[#allocation2 + $0x88] sm:$0xf] }
 0x14f   : > { %v641_v47 = vsel %vm2735_vm2, %v639_v44, %v638_v40  ;;  %648 = vst.msk [vmem:[#allocation2 + $0x68] sm:$0xf] %vm2734_vm3, %v639_v44  ;;  %v1562_v48 = vor.u32 %v1751_v45, %v1559_v46  ;;  %v1557_v49 = vld [vmem:[#allocation2 + $0x84] sm:$0xf] }
 0x150   : > { %646 = vst.msk [vmem:[#allocation2 + $0x60] sm:$0xff] %vm2489_vm4, %v641_v47  ;;  %v1558_v54 = vor.u32 %v1752_v50, %v1557_v49 }
 0x151   : > { %786 = vmatpush.bf16.msra.mxu3 %v1562_v48 }
 0x152   : > { %772 = vmatpush.bf16.msra.mxu2 %v1558_v54 }
 0x154   : > { %v650_v33 = vpop.permute.xlu0 %649  ;;  %v864_v56 = vpop.permute.xlu2 %863 }
 0x155   : > { %v651_v52 = vrot.slane %v650_v33, 4  ;;  %v865_v53 = vrot.slane %v864_v56, 4  ;;  %v626_v58 = vpop.permute.xlu1 %625 }
 0x156   : > { %v627_v59 = vrot.slane %v626_v58, 4  ;;  %v1749_v11 = vld [vmem:[#allocation2 + $0x68] sm:$0xf] }
 0x157   : > { %v653_v60 = vsel %vm2736_vm6, %v651_v52, %v650_v33  ;;  %660 = vst.msk [vmem:[#allocation2 + $0x78] sm:$0xf] %vm2731_vm7, %v651_v52  ;;  %v866_v62 = vsel %vm2730_vm13, %v865_v53, %v864_v56  ;;  %vm619_vm13 = vcmask 1043464   ;;  %vm603_vm7 = vcmask 121856   ;;  %v1549_v15 = vld [vmem:[#allocation2 + $0x64] sm:$0xf] }
 0x158   : > { %658 = vst.msk [vmem:[#allocation2 + $0x70] sm:$0xff] %vm2498_vm9, %v653_v60  ;;  %v629_v0 = vsel %vm2732_vm10, %v627_v59, %v626_v58  ;;  %vm615_vm10 = vcmask 7168  }
 0x159   : > { %869 = vst.msk [vmem:[#allocation2 + $0x80] sm:$0xff] %vm2480_vm15, %v866_v62 }
 0x15a   : > { %870 = vst.msk [vmem:[#allocation2 + $0x88] sm:$0xf] %vm2733_vm14, %v865_v53  ;;  %vm2525_vm14 = vmor %vm581_vm0, %vm619_vm13  ;;  %vm576_vm13 = vcmask 138240  }
 0x15b   : > { %634 = vst.msk [vmem:[#allocation2 + $0x50] sm:$0xff] %vm2508_vm1, %v629_v0 }
 0x15c   : > { %636 = vst.msk [vmem:[#allocation2 + $0x58] sm:$0xf] %vm635_vm5, %v627_v59  ;;  %v601_v61 = vpop.permute.xlu0 %600  ;;  %v848_v1 = vpop.permute.xlu2 %847 }
 0x15d   : > { %v602_v3 = vrot.slane %v601_v61, 4  ;;  %v849_v4 = vrot.slane %v848_v1, 4  ;;  %v613_v5 = vpop.permute.xlu1 %612 }
 0x15e   : > { %v614_v10 = vrot.slane %v613_v5, 4  ;;  %v1551_v22 = vld [vmem:[#allocation2 + $0x74] sm:$0xf0] }
 0x15f   : > { %v604_v39 = vsel %vm603_vm7, %v602_v3, %v601_v61  ;;  %v1554_v12 = vor.u32 %v1749_v11, %v1551_v22  ;;  %v1750_v16 = vld [vmem:[#allocation2 + $0x70] sm:$0xf0]  ;;  %v850_v20 = vsel %vm2735_vm2, %v849_v4, %v848_v1  ;;  %854 = vst.msk [vmem:[#allocation2 + $0x68] sm:$0xf] %vm2734_vm3, %v849_v4  ;;  %vm2780_vm3 = vcmask 912384   ;;  %vm2544_vm2 = vmor %vm581_vm0, %vm580_vm11 }
 0x160   : > { %609 = vst.msk [vmem:[#allocation2 + $0x24] sm:$0xff] %vm2520_vm12, %v604_v39  ;;  %v616_v41 = vsel %vm615_vm10, %v614_v10, %v613_v5  ;;  %v1550_v17 = vor.u32 %v1750_v16, %v1549_v15  ;;  %v1611_v18 = vld [vmem:[#allocation2 + $0x84] sm:$0xf]  ;;  %vm2783_vm0 = vcmask 1039360   ;;  %v1744_v5 = vld [vmem:[#allocation2 + $0x10] sm:$0xf0] }
 0x161   : > { %621 = vst.msk [vmem:[#allocation2 + $0x34] sm:$0xff] %vm2525_vm14, %v616_v41  ;;  %787 = vmatpush.bf16.msra.mxu3 %v1554_v12  ;;  %v1764_v21 = vld [vmem:[#allocation2 + $0x88] sm:$0xf]  ;;  %v1612_v24 = vor.u32 %v1765_v19, %v1611_v18  ;;  %v1527_v10 = vld [vmem:[#allocation2 + $0x14] sm:$0xf0]  ;;  %vm2785_vm11 = vcmask 912384  }
 0x162   : > { %v1616_v25 = vor.u32 %v1764_v21, %v1613_v23  ;;  %773 = vmatpush.bf16.msra.mxu2 %v1550_v17  ;;  %v1748_v43 = vld [vmem:[#allocation2 + $0x50] sm:$0xf0]  ;;  %853 = vst.msk [vmem:[#allocation2 + $0x60] sm:$0xff] %vm2489_vm4, %v850_v20  ;;  %v1755_v41 = vld [vmem:[%s2727_s3] sm:$0xff]  ;;  %v1675_v19 = vld [vmem:[#allocation2 + $0xb4] sm:$0xf0] }
 0x163   : > { %968 = vmatpush.bf16.msrb.mxu0 %v1612_v24  ;;  %v1543_v26 = vld [vmem:[#allocation2 + $0x54] sm:$0xf0]  ;;  %v1542_v30 = vor.u32 %v1748_v43, %v2385_v31  ;;  %v1780_v16 = vld [vmem:[#allocation2 + $0xb0] sm:$0xf0]  ;;  %v1673_v24 = vld [vmem:[#allocation2 + $0xa4] sm:$0xf] }
 0x164   : > { %982 = vmatpush.bf16.msrb.mxu1 %v1616_v25  ;;  %v856_v27 = vpop.permute.xlu0 %855  ;;  %v823_v28 = vpop.permute.xlu2 %822  ;;  %v1546_v51 = vor.u32 %v2381_v29, %v1543_v26  ;;  %v1674_v43 = vor.u32 %v1780_v16, %v1673_v24  ;;  %v1779_v26 = vld [vmem:[#allocation2 + $0xa8] sm:$0xf] }
 0x165   : > { %v857_v32 = vrot.slane %v856_v27, 4  ;;  %v824_v34 = vrot.slane %v823_v28, 4  ;;  %v574_v37 = vpop.permute.xlu1 %573 }
 0x166   : > { %v575_v38 = vrot.slane %v574_v37, 4  ;;  %788 = vmatpush.bf16.msra.mxu3 %v1546_v51  ;;  %774 = vmatpush.bf16.msra.mxu2 %v1542_v30  ;;  %v1762_v59 = vld [vmem:[#allocation2 + $0x68] sm:$0xf]  ;;  %v1678_v51 = vor.u32 %v1779_v26, %v1675_v19 }
 0x167   : > { %v858_v40 = vsel %vm2736_vm6, %v857_v32, %v856_v27  ;;  %862 = vst.msk [vmem:[#allocation2 + $0x78] sm:$0xf] %vm2780_vm3, %v857_v32  ;;  %v1533_v45 = vld [vmem:[#allocation2 + $0x24] sm:$0xf]  ;;  %v1745_v29 = vld [vmem:[#allocation2 + $0x28] sm:$0xf]  ;;  %v825_v48 = vsel %vm603_vm7, %v824_v34, %v823_v28 }
 0x168   : > { %861 = vst.msk [vmem:[#allocation2 + $0x70] sm:$0xff] %vm2498_vm9, %v858_v40  ;;  %v577_v31 = vsel %vm576_vm13, %v575_v38, %v574_v37  ;;  %v1746_v46 = vld [vmem:[#allocation2 + $0x30] sm:$0xf0]  ;;  %v1535_v47 = vld [vmem:[#allocation2 + $0x34] sm:$0xf0]  ;;  %vm2784_vm3 = vcmask 130048  }
 0x169   : > { %v1534_v49 = vor.u32 %v1746_v46, %v1533_v45  ;;  %v1538_v50 = vor.u32 %v1745_v29, %v1535_v47  ;;  %583 = vst.msk [vmem:[#allocation2 + $0x4] sm:$0xff] %vm2544_vm2, %v577_v31  ;;  %v1603_v61 = vld [vmem:[#allocation2 + $0x64] sm:$0xf] }
 0x16a   : > { %828 = vst.msk [vmem:[#allocation2 + $0x24] sm:$0xff] %vm2520_vm12, %v825_v48 }
 0x16b   : > { %775 = vmatpush.bf16.msra.mxu2 %v1534_v49  ;;  %789 = vmatpush.bf16.msra.mxu3 %v1538_v50 }
 0x16c   : > { %v840_v54 = vpop.permute.xlu0 %839  ;;  %v1052_v33 = vpop.permute.xlu2 %1051 }
 0x16d   : > { %v841_v56 = vrot.slane %v840_v54, 4  ;;  %v1053_v52 = vrot.slane %v1052_v33, 4  ;;  %v814_v53 = vpop.permute.xlu1 %813 }
 0x16e   : > { %v815_v58 = vrot.slane %v814_v53, 4  ;;  %v1605_v60 = vld [vmem:[#allocation2 + $0x74] sm:$0xf0] }
 0x16f   : > { %v842_v62 = vsel %vm2783_vm0, %v841_v56, %v840_v54  ;;  %846 = vst.msk [vmem:[#allocation2 + $0x58] sm:$0xf] %vm635_vm5, %v841_v56  ;;  %v1608_v0 = vor.u32 %v1762_v59, %v1605_v60  ;;  %v1763_v1 = vld [vmem:[#allocation2 + $0x70] sm:$0xf0]  ;;  %v1054_v3 = vsel %vm2736_vm6, %v1053_v52, %v1052_v33  ;;  %vm758_vm0 = vcmask 850944  }
 0x170   : > { %845 = vst.msk [vmem:[#allocation2 + $0x50] sm:$0xff] %vm2508_vm1, %v842_v62  ;;  %v1604_v4 = vor.u32 %v1763_v1, %v1603_v61  ;;  %v816_v11 = vsel %vm2784_vm3, %v815_v58, %v814_v53  ;;  %v1525_v22 = vld [vmem:[#allocation2 + $0x4] sm:$0xf]  ;;  %v1743_v39 = vld [vmem:[#allocation2 + $0x8] sm:$0xf]  ;;  %vm2786_vm3 = vcmask 908288  }
 0x171   : > { %983 = vmatpush.bf16.msrb.mxu1 %v1608_v0  ;;  %1058 = vst.msk [vmem:[#allocation2 + $0x78] sm:$0xf] %vm2785_vm11, %v1053_v52  ;;  %v1526_v12 = vor.u32 %v1744_v5, %v1525_v22  ;;  %v1530_v15 = vor.u32 %v1743_v39, %v1527_v10  ;;  %vm2787_vm11 = vcmask 1039360   ;;  %vm2788_vm6 = vcmask 904192   ;;  %v1587_v29 = vld [vmem:[#allocation2 + $0x24] sm:$0xf] }
 0x172   : > { %969 = vmatpush.bf16.msrb.mxu0 %v1604_v4  ;;  %1057 = vst.msk [vmem:[#allocation2 + $0x70] sm:$0xff] %vm2498_vm9, %v1054_v3  ;;  %v1758_v31 = vld [vmem:[#allocation2 + $0x28] sm:$0xf]  ;;  %v1778_v52 = vld [vmem:[#allocation2 + $0x90] sm:$0xf0] }
 0x173   : > { %776 = vmatpush.bf16.msra.mxu2 %v1526_v12  ;;  %790 = vmatpush.bf16.msra.mxu3 %v1530_v15  ;;  %819 = vst.msk [vmem:[#allocation2 + $0x14] sm:$0xff] %vm2472_vm8, %v816_v11  ;;  %v1667_v59 = vld [vmem:[#allocation2 + $0x94] sm:$0xf0] }
 0x174   : > { %v831_v17 = vpop.permute.xlu0 %830  ;;  %v1036_v18 = vpop.permute.xlu2 %1035 }
 0x175   : > { %v832_v20 = vrot.slane %v831_v17, 4  ;;  %v1037_v21 = vrot.slane %v1036_v18, 4  ;;  %v1060_v23 = vpop.permute.xlu1 %1059 }
 0x176   : > { %v1061_v25 = vrot.slane %v1060_v23, 4  ;;  %v1597_v27 = vld [vmem:[#allocation2 + $0x54] sm:$0xf0]  ;;  %1571 = vmatmul.msk.bf16.vlgmr.msra.gmra.mxu2 %vm758_vm0, %v1755_v41  ;;  %1572 = vmatmul.msk.bf16.vlgmr.msra.gmra.mxu3 %vm758_vm0, %v1755_v41 }
 0x177   : > { %1162 = vmatpush.bf16.msrb.mxu2 %v2437_v13  ;;  %1176 = vmatpush.bf16.msrb.mxu3 %v2439_v14  ;;  %v833_v28 = vsel %vm615_vm10, %v832_v20, %v831_v17  ;;  %v1600_v30 = vor.u32 %v2407_v55, %v1597_v27  ;;  %v1761_v32 = vld [vmem:[#allocation2 + $0x50] sm:$0xf0]  ;;  %v1038_v38 = vsel %vm2787_vm11, %v1037_v21, %v1036_v18  ;;  %v1729_v18 = vld [vmem:[#allocation2 + $0xb4] sm:$0xf0]  ;;  %vm2791_vm11 = vcmask 130048  }
 0x178   : > { %836 = vst.msk [vmem:[#allocation2 + $0x34] sm:$0xff] %vm2525_vm14, %v833_v28  ;;  %v1062_v34 = vsel %vm2786_vm3, %v1061_v25, %v1060_v23  ;;  %v1596_v37 = vor.u32 %v1761_v32, %v2411_v57  ;;  %vm2790_vm3 = vcmask 920576   ;;  %v1793_v17 = vld [vmem:[#allocation2 + $0xb0] sm:$0xf0]  ;;  %v1768_v23 = vld [vmem:[%s2727_s3 + $0x8] sm:$0xff] }
 0x179   : > { %1065 = vst.msk [vmem:[#allocation2 + $0x80] sm:$0xff] %vm2480_vm15, %v1062_v34  ;;  %984 = vmatpush.bf16.msrb.mxu1 %v1600_v30  ;;  %v1776_v26 = vld [vmem:[#allocation2 + $0x70] sm:$0xf0] }
 0x17a   : > { %1066 = vst.msk [vmem:[#allocation2 + $0x88] sm:$0xf] %vm2788_vm6, %v1061_v25  ;;  %970 = vmatpush.bf16.msrb.mxu0 %v1596_v37  ;;  %vm2789_vm6 = vcmask 924672   ;;  %v1757_v5 = vld [vmem:[#allocation2 + $0x10] sm:$0xf0] }
 0x17b   : > { %1163 = vmatpush.bf16.msrb.mxu2 %v1674_v43  ;;  %1177 = vmatpush.bf16.msrb.mxu3 %v1678_v51  ;;  %1042 = vst.msk [vmem:[#allocation2 + $0x58] sm:$0xf] %vm635_vm5, %v1037_v21  ;;  %v1581_v10 = vld [vmem:[#allocation2 + $0x14] sm:$0xf0]  ;;  %v1727_v51 = vld [vmem:[#allocation2 + $0xa4] sm:$0xf] }
 0x17c   : > { %1041 = vst.msk [vmem:[#allocation2 + $0x50] sm:$0xff] %vm2508_vm1, %v1038_v38  ;;  %v805_v55 = vpop.permute.xlu0 %804  ;;  %v1027_v40 = vpop.permute.xlu2 %1026  ;;  %v1659_v21 = vld [vmem:[#allocation2 + $0x74] sm:$0xf0]  ;;  %v1792_v37 = vld [vmem:[#allocation2 + $0xa8] sm:$0xf] }
 0x17d   : > { %v806_v45 = vrot.slane %v805_v55, 4  ;;  %v1028_v57 = vrot.slane %v1027_v40, 4  ;;  %v1044_v47 = vpop.permute.xlu1 %1043 }
 0x17e   : > { %v1045_v50 = vrot.slane %v1044_v47, 4 }
 0x17f   : > { %v807_v46 = vsel %vm576_vm13, %v806_v45, %v805_v55  ;;  %v1759_v48 = vld [vmem:[#allocation2 + $0x30] sm:$0xf0]  ;;  %v1589_v49 = vld [vmem:[#allocation2 + $0x34] sm:$0xf0]  ;;  %v1029_v53 = vsel %vm615_vm10, %v1028_v57, %v1027_v40  ;;  %v1728_v40 = vor.u32 %v1793_v17, %v1727_v51  ;;  %v1732_v45 = vor.u32 %v1792_v37, %v1729_v18 }
 0x180   : > { %810 = vst.msk [vmem:[#allocation2 + $0x4] sm:$0xff] %vm2544_vm2, %v807_v46  ;;  %v1588_v54 = vor.u32 %v1759_v48, %v1587_v29  ;;  %v1592_v33 = vor.u32 %v1758_v31, %v1589_v49  ;;  %v1665_v56 = vld [vmem:[#allocation2 + $0x84] sm:$0xf]  ;;  %v1046_v62 = vsel %vm2789_vm6, %v1045_v50, %v1044_v47  ;;  %vm2792_vm6 = vcmask 908288  }
 0x181   : > { %v1777_v58 = vld [vmem:[#allocation2 + $0x88] sm:$0xf]  ;;  %v1666_v60 = vor.u32 %v1778_v52, %v1665_v56  ;;  %1050 = vst.msk [vmem:[#allocation2 + $0x68] sm:$0xf] %vm2790_vm3, %v1045_v50  ;;  %vm2793_vm3 = vcmask 904192  }
 0x182   : > { %971 = vmatpush.bf16.msrb.mxu0 %v1588_v54  ;;  %985 = vmatpush.bf16.msrb.mxu1 %v1592_v33  ;;  %v1670_v0 = vor.u32 %v1777_v58, %v1667_v59  ;;  %1049 = vst.msk [vmem:[#allocation2 + $0x60] sm:$0xff] %vm2489_vm4, %v1046_v62  ;;  %v1651_v28 = vld [vmem:[#allocation2 + $0x54] sm:$0xf0] }
 0x183   : > { %1164 = vmatpush.bf16.msrb.mxu2 %v1666_v60  ;;  %1032 = vst.msk [vmem:[#allocation2 + $0x34] sm:$0xff] %vm2525_vm14, %v1029_v53  ;;  %v1774_v34 = vld [vmem:[#allocation2 + $0x50] sm:$0xf0] }
 0x184   : > { %1178 = vmatpush.bf16.msrb.mxu3 %v1670_v0  ;;  %v1010_v61 = vpop.permute.xlu0 %1009  ;;  %v1001_v1 = vpop.permute.xlu2 %1000  ;;  %v1650_v29 = vor.u32 %v1774_v34, %v2426_v7  ;;  %v1721_v0 = vld [vmem:[#allocation2 + $0x94] sm:$0xf0] }
 0x185   : > { %v1011_v3 = vrot.slane %v1010_v61, 4  ;;  %v1002_v4 = vrot.slane %v1001_v1, 4  ;;  %v1019_v22 = vpop.permute.xlu1 %1018 }
 0x186   : > { %v1020_v15 = vrot.slane %v1019_v22, 4 }
 0x187   : > { %v1003_v11 = vsel %vm576_vm13, %v1002_v4, %v1001_v1  ;;  %v1579_v39 = vld [vmem:[#allocation2 + $0x4] sm:$0xf]  ;;  %v1756_v12 = vld [vmem:[#allocation2 + $0x8] sm:$0xf]  ;;  %v1012_v19 = vsel %vm2791_vm11, %v1011_v3, %v1010_v61  ;;  %vm2794_vm11 = vcmask 916480  }
 0x188   : > { %v1580_v16 = vor.u32 %v1757_v5, %v1579_v39  ;;  %v1584_v41 = vor.u32 %v1756_v12, %v1581_v10  ;;  %1006 = vst.msk [vmem:[#allocation2 + $0x4] sm:$0xff] %vm2544_vm2, %v1003_v11  ;;  %v1775_v20 = vld [vmem:[#allocation2 + $0x68] sm:$0xf]  ;;  %v1021_v24 = vsel %vm603_vm7, %v1020_v15, %v1019_v22  ;;  %v1791_v5 = vld [vmem:[#allocation2 + $0x90] sm:$0xf0] }
 0x189   : > { %v1662_v25 = vor.u32 %v1775_v20, %v1659_v21  ;;  %v1657_v43 = vld [vmem:[#allocation2 + $0x64] sm:$0xf]  ;;  %1024 = vst.msk [vmem:[#allocation2 + $0x24] sm:$0xff] %vm2520_vm12, %v1021_v24  ;;  %v1781_v22 = vld [vmem:[%s2727_s3 + $0x10] sm:$0xff] }
 0x18a   : > { %972 = vmatpush.bf16.msrb.mxu0 %v1580_v16  ;;  %986 = vmatpush.bf16.msrb.mxu1 %v1584_v41  ;;  %v1658_v27 = vor.u32 %v1776_v26, %v1657_v43  ;;  %1015 = vst.msk [vmem:[#allocation2 + $0x14] sm:$0xff] %vm2472_vm8, %v1012_v19  ;;  %v1643_v47 = vld [vmem:[#allocation2 + $0x34] sm:$0xf0] }
 0x18b   : > { %1179 = vmatpush.bf16.msrb.mxu3 %v1662_v25  ;;  %v1786_v25 = vld [vmem:[#allocation2 + $0x48] sm:$0xf] }
 0x18c   : > { %v1256_v30 = vpop.permute.xlu0 %1255  ;;  %v1215_v32 = vpop.permute.xlu2 %1214  ;;  %1165 = vmatpush.bf16.msrb.mxu2 %v1658_v27  ;;  %v1703_v27 = vld [vmem:[#allocation2 + $0x44] sm:$0xf] }
 0x18d   : > { %v1257_v38 = vrot.slane %v1256_v30, 4  ;;  %v1216_v55 = vrot.slane %v1215_v32, 4  ;;  %1625 = vmatmul.msk.bf16.vlgmr.msrb.gmra.mxu0 %vm758_vm0, %v1768_v23  ;;  %1626 = vmatmul.msk.bf16.vlgmr.msrb.gmra.mxu1 %vm758_vm0, %v1768_v23  ;;  %v1248_v57 = vpop.permute.xlu1 %1247 }
 0x18e   : > { %1358 = vmatpush.bf16.msra.mxu0 %v2437_v13  ;;  %1372 = vmatpush.bf16.msra.mxu1 %v2439_v14  ;;  %v1654_v13 = vor.u32 %v2424_v6, %v1651_v28  ;;  %v1249_v31 = vrot.slane %v1248_v57, 4  ;;  %v1772_v6 = vld [vmem:[#allocation2 + $0x30] sm:$0xf0] }
 0x18f   : > { %v1258_v14 = vsel %vm2792_vm6, %v1257_v38, %v1256_v30  ;;  %1262 = vst.msk [vmem:[#allocation2 + $0x88] sm:$0xf] %vm2793_vm3, %v1257_v38  ;;  %v1217_v46 = vsel %vm603_vm7, %v1216_v55, %v1215_v32  ;;  %vm2795_vm6 = vcmask 912384   ;;  %v1633_v36 = vld [vmem:[#allocation2 + $0x4] sm:$0xf]  ;;  %vm2797_vm7 = vcmask 920576  }
 0x190   : > { %1261 = vst.msk [vmem:[#allocation2 + $0x80] sm:$0xff] %vm2480_vm15, %v1258_v14  ;;  %1180 = vmatpush.bf16.msrb.mxu3 %v1654_v13  ;;  %1166 = vmatpush.bf16.msrb.mxu2 %v1650_v29  ;;  %v1250_v48 = vsel %vm2794_vm11, %v1249_v31, %v1248_v57  ;;  %v1641_v49 = vld [vmem:[#allocation2 + $0x24] sm:$0xf]  ;;  %v1771_v50 = vld [vmem:[#allocation2 + $0x28] sm:$0xf]  ;;  %vm2796_vm15 = vcmask 924672  }
 0x191   : > { %1254 = vst.msk [vmem:[#allocation2 + $0x78] sm:$0xf] %vm2795_vm6, %v1249_v31  ;;  %v1642_v7 = vor.u32 %v1772_v6, %v1641_v49  ;;  %v1646_v54 = vor.u32 %v1771_v50, %v1643_v47  ;;  %v1769_v33 = vld [vmem:[#allocation2 + $0x8] sm:$0xf]  ;;  %v1770_v53 = vld [vmem:[#allocation2 + $0x10] sm:$0xf0] }
 0x192   : > { %1359 = vmatpush.bf16.msra.mxu0 %v1728_v40  ;;  %1373 = vmatpush.bf16.msra.mxu1 %v1732_v45  ;;  %1253 = vst.msk [vmem:[#allocation2 + $0x70] sm:$0xff] %vm2498_vm9, %v1250_v48  ;;  %v1635_v58 = vld [vmem:[#allocation2 + $0x14] sm:$0xf0]  ;;  %v1634_v1 = vor.u32 %v1770_v53, %v1633_v36  ;;  %vm2798_vm9 = vcmask 130048   ;;  %v1901_v31 = vld [vmem:[%s2190_s5] sm:$0xff]  ;;  %v1903_v50 = vld [vmem:[%s2190_s5 + $0x10] sm:$0xff] }
 0x193   : > { %1220 = vst.msk [vmem:[#allocation2 + $0x24] sm:$0xff] %vm2520_vm12, %v1217_v46  ;;  %v1638_v3 = vor.u32 %v1769_v33, %v1635_v58  ;;  %vm2799_vm12 = vcmask 1039360   ;;  %v1794_v14 = vld [vmem:[%s2727_s3 + $0x18] sm:$0xff] }
 0x194   : > { %v1240_v56 = vpop.permute.xlu0 %1239  ;;  %v1206_v52 = vpop.permute.xlu2 %1205  ;;  %1167 = vmatpush.bf16.msrb.mxu2 %v1642_v7  ;;  %1181 = vmatpush.bf16.msrb.mxu3 %v1646_v54  ;;  %v1902_v6 = vld [vmem:[%s2190_s5 + $0x8] sm:$0xff]  ;;  %v1904_v54 = vld [vmem:[%s2190_s5 + $0x18] sm:$0xff] }
 0x195   : > { %v1241_v59 = vrot.slane %v1240_v56, 4  ;;  %v1207_v60 = vrot.slane %v1206_v52, 4  ;;  %v1232_v61 = vpop.permute.xlu1 %1231  ;;  %v1906_v58 = vld [vmem:[%s2190_s5 + $0x28] sm:$0xff] }
 0x196   : > { %v1790_v62 = vld [vmem:[#allocation2 + $0x88] sm:$0xf]  ;;  %v1233_v10 = vrot.slane %v1232_v61, 4 }
 0x197   : > { %v1242_v35 = vsel %vm2796_vm15, %v1241_v59, %v1240_v56  ;;  %1246 = vst.msk [vmem:[#allocation2 + $0x68] sm:$0xf] %vm2797_vm7, %v1241_v59  ;;  %v1724_v4 = vor.u32 %v1790_v62, %v1721_v0  ;;  %v1719_v2 = vld [vmem:[#allocation2 + $0x84] sm:$0xf]  ;;  %v1208_v39 = vsel %vm2798_vm9, %v1207_v60, %v1206_v52  ;;  %v1905_v56 = vld [vmem:[%s2190_s5 + $0x20] sm:$0xff] }
 0x198   : > { %1245 = vst.msk [vmem:[#allocation2 + $0x60] sm:$0xff] %vm2489_vm4, %v1242_v35  ;;  %v1720_v11 = vor.u32 %v1791_v5, %v1719_v2  ;;  %1168 = vmatpush.bf16.msrb.mxu2 %v1634_v1  ;;  %1182 = vmatpush.bf16.msrb.mxu3 %v1638_v3  ;;  %v1234_v12 = vsel %vm2799_vm12, %v1233_v10, %v1232_v61  ;;  %v1713_v41 = vld [vmem:[#allocation2 + $0x74] sm:$0xf0]  ;;  %v1907_v62 = vld [vmem:[%s2190_s5 + $0x30] sm:$0xff]  ;;  %v1908_v61 = vld [vmem:[%s2190_s5 + $0x38] sm:$0xff] }
 0x199   : > { %1238 = vst.msk [vmem:[#allocation2 + $0x58] sm:$0xf] %vm635_vm5, %v1233_v10  ;;  %1374 = vmatpush.bf16.msra.mxu1 %v1724_v4  ;;  %v1789_v21 = vld [vmem:[#allocation2 + $0x70] sm:$0xf0]  ;;  %v1910_v10 = vld [vmem:[%s2190_s5 + $0x48] sm:$0xff] }
 0x19a   : > { %1360 = vmatpush.bf16.msra.mxu0 %v1720_v11  ;;  %1237 = vst.msk [vmem:[#allocation2 + $0x50] sm:$0xff] %vm2508_vm1, %v1234_v12  ;;  %v1695_v51 = vld [vmem:[#allocation2 + $0x24] sm:$0xf]  ;;  %v1784_v30 = vld [vmem:[#allocation2 + $0x28] sm:$0xf]  ;;  %v1909_v2 = vld [vmem:[%s2190_s5 + $0x40] sm:$0xff] }
 0x19b   : > { %1211 = vst.msk [vmem:[#allocation2 + $0x14] sm:$0xff] %vm2472_vm8, %v1208_v39  ;;  %1679 = vmatmul.msk.bf16.vlgmr.msrb.gmra.mxu2 %vm758_vm0, %v1781_v22  ;;  %1680 = vmatmul.msk.bf16.vlgmr.msrb.gmra.mxu3 %vm758_vm0, %v1781_v22  ;;  %v1911_v12 = vld [vmem:[%s2190_s5 + $0x50] sm:$0xff] }
 0x19c   : > { %v1223_v42 = vpop.permute.xlu0 %1222 }
 0x19d   : > { %v1224_v15 = vrot.slane %v1223_v42, 4  ;;  %v1197_v18 = vpop.permute.xlu1 %1196 }
 0x19e   : > { %v1788_v16 = vld [vmem:[#allocation2 + $0x68] sm:$0xf]  ;;  %v1198_v63 = vrot.slane %v1197_v18, 4 }
 0x19f   : > { %v1225_v17 = vsel %vm615_vm10, %v1224_v15, %v1223_v42  ;;  %v1716_v19 = vor.u32 %v1788_v16, %v1713_v41  ;;  %v1711_v20 = vld [vmem:[#allocation2 + $0x64] sm:$0xf]  ;;  %v1912_v15 = vld [vmem:[%s2190_s5 + $0x58] sm:$0xff] }
 0x1a0   : > { %1228 = vst.msk [vmem:[#allocation2 + $0x34] sm:$0xff] %vm2525_vm14, %v1225_v17  ;;  %v1712_v9 = vor.u32 %v1789_v21, %v1711_v20  ;;  %v1705_v23 = vld [vmem:[#allocation2 + $0x54] sm:$0xf0]  ;;  %v1199_v24 = vsel %vm576_vm13, %v1198_v63, %v1197_v18  ;;  %v1913_v18 = vld [vmem:[%s2190_s5 + $0x60] sm:$0xff] }
 0x1a1   : > { %1375 = vmatpush.bf16.msra.mxu1 %v1716_v19  ;;  %v1787_v43 = vld [vmem:[#allocation2 + $0x50] sm:$0xf0]  ;;  %1202 = vst.msk [vmem:[#allocation2 + $0x4] sm:$0xff] %vm2544_vm2, %v1199_v24  ;;  %v1708_v26 = vor.u32 %v1786_v25, %v1705_v23  ;;  %v1914_v20 = vld [vmem:[%s2190_s5 + $0x68] sm:$0xff]  ;;  %v1915_v23 = vld [vmem:[%s2190_s5 + $0x70] sm:$0xff] }
 0x1a2   : > { %1361 = vmatpush.bf16.msra.mxu0 %v1712_v9  ;;  %v1704_v28 = vor.u32 %v1787_v43, %v1703_v27  ;;  %v1783_v44 = vld [vmem:[#allocation2 + $0x10] sm:$0xf0]  ;;  %v1689_v40 = vld [vmem:[#allocation2 + $0x14] sm:$0xf0]  ;;  %v1916_v25 = vld [vmem:[%s2190_s5 + $0x78] sm:$0xff] }
 0x1a5   : > { %1376 = vmatpush.bf16.msra.mxu1 %v1708_v26 }
 0x1a6   : > { %1362 = vmatpush.bf16.msra.mxu0 %v1704_v28 }
 0x1a7   : > { %v1785_v8 = vld [vmem:[#allocation2 + $0x30] sm:$0xf0]  ;;  %v1697_v32 = vld [vmem:[#allocation2 + $0x34] sm:$0xf0] }
 0x1a8   : > { %v1696_v34 = vor.u32 %v1785_v8, %v1695_v51  ;;  %v1700_v37 = vor.u32 %v1784_v30, %v1697_v32  ;;  %v1687_v38 = vld [vmem:[#allocation2 + $0x4] sm:$0xf]  ;;  %v1782_v55 = vld [vmem:[#allocation2 + $0x8] sm:$0xf] }
 0x1a9   : > { %v1688_v45 = vor.u32 %v1783_v44, %v1687_v38  ;;  %v1692_v13 = vor.u32 %v1782_v55, %v1689_v40 }
 0x1aa   : > { %1363 = vmatpush.bf16.msra.mxu0 %v1696_v34  ;;  %1377 = vmatpush.bf16.msra.mxu1 %v1700_v37 }
 0x1ae   : > { %1364 = vmatpush.bf16.msra.mxu0 %v1688_v45  ;;  %1378 = vmatpush.bf16.msra.mxu1 %v1692_v13 }
 0x1b1   : > { %1733 = vmatmul.msk.bf16.vlgmr.msra.gmra.mxu0 %vm758_vm0, %v1794_v14  ;;  %1734 = vmatmul.msk.bf16.vlgmr.msra.gmra.mxu1 %vm758_vm0, %v1794_v14 }
 0x1f9   : > { %v778_v57 = vpop.f32.mrf.mxu2  ;;  %v792_v29 = vpop.f32.mrf.mxu3 }
 0x1fa   : > { %v779_v46 = vadd.f32 %v1901_v31, %v778_v57  ;;  %v793_v47 = vadd.f32 %v1902_v6, %v792_v29 }
 0x1fc   : > { %797 = vst [vmem:[%s2657_s10] sm:$0xff] %v779_v46 }
 0x1fd   : > { %798 = vst [vmem:[%s2657_s10 + $0x8] sm:$0xff] %v793_v47 }
 0x201   : > { %v780_v48 = vpop.f32.mrf.mxu2  ;;  %v794_v49 = vpop.f32.mrf.mxu3 }
 0x202   : > { %v781_v7 = vadd.f32 %v1903_v50, %v780_v48  ;;  %v795_v36 = vadd.f32 %v1904_v54, %v794_v49 }
 0x204   : > { %799 = vst [vmem:[%s2657_s10 + $0x10] sm:$0xff] %v781_v7 }
 0x205   : > { %800 = vst [vmem:[%s2657_s10 + $0x18] sm:$0xff] %v795_v36 }
 0x20a   : > { %v974_v33 = vpop.f32.mrf.mxu0  ;;  %v988_v53 = vpop.f32.mrf.mxu1 }
 0x20b   : > { %v975_v52 = vadd.f32 %v1905_v56, %v974_v33  ;;  %v989_v59 = vadd.f32 %v1906_v58, %v988_v53 }
 0x20d   : > { %993 = vst [vmem:[%s2657_s10 + $0x20] sm:$0xff] %v975_v52 }
 0x20e   : > { %994 = vst [vmem:[%s2657_s10 + $0x28] sm:$0xff] %v989_v59 }
 0x212   : > { %v976_v60 = vpop.f32.mrf.mxu0  ;;  %v990_v35 = vpop.f32.mrf.mxu1 }
 0x213   : > { %v977_v0 = vadd.f32 %v1907_v62, %v976_v60  ;;  %v991_v1 = vadd.f32 %v1908_v61, %v990_v35 }
 0x215   : > { %995 = vst [vmem:[%s2657_s10 + $0x30] sm:$0xff] %v977_v0 }
 0x216   : > { %996 = vst [vmem:[%s2657_s10 + $0x38] sm:$0xff] %v991_v1 }
 0x21e   : > { %v1170_v3 = vpop.f32.mrf.mxu2  ;;  %v1184_v4 = vpop.f32.mrf.mxu3 }
 0x21f   : > { %v1171_v5 = vadd.f32 %v1909_v2, %v1170_v3  ;;  %v1185_v11 = vadd.f32 %v1910_v10, %v1184_v4 }
 0x221   : > { %1189 = vst [vmem:[%s2657_s10 + $0x40] sm:$0xff] %v1171_v5 }
 0x222   : > { %1190 = vst [vmem:[%s2657_s10 + $0x48] sm:$0xff] %v1185_v11 }
 0x226   : > { %v1172_v22 = vpop.f32.mrf.mxu2  ;;  %v1186_v39 = vpop.f32.mrf.mxu3 }
 0x227   : > { %v1173_v42 = vadd.f32 %v1911_v12, %v1172_v22  ;;  %v1187_v16 = vadd.f32 %v1912_v15, %v1186_v39 }
 0x229   : > { %1191 = vst [vmem:[%s2657_s10 + $0x50] sm:$0xff] %v1173_v42 }
 0x22a   : > { %1192 = vst [vmem:[%s2657_s10 + $0x58] sm:$0xff] %v1187_v16 }
 0x22e   : > { %v1366_v41 = vpop.f32.mrf.mxu0  ;;  %v1380_v17 = vpop.f32.mrf.mxu1 }
 0x22f   : > { %v1367_v19 = vadd.f32 %v1913_v18, %v1366_v41  ;;  %v1381_v21 = vadd.f32 %v1914_v20, %v1380_v17 }
 0x231   : > { %1385 = vst [vmem:[%s2657_s10 + $0x60] sm:$0xff] %v1367_v19 }
 0x232   : > { %1386 = vst [vmem:[%s2657_s10 + $0x68] sm:$0xff] %v1381_v21 }
 0x236   : > { %v1368_v63 = vpop.f32.mrf.mxu0  ;;  %v1382_v9 = vpop.f32.mrf.mxu1 }
 0x237   : > { %v1369_v24 = vadd.f32 %v1915_v23, %v1368_v63  ;;  %v1383_v43 = vadd.f32 %v1916_v25, %v1382_v9 }
 0x239   : > { %1387 = vst [vmem:[%s2657_s10 + $0x70] sm:$0xff] %v1369_v24 }
 0x23a   : > { %1388 = vst [vmem:[%s2657_s10 + $0x78] sm:$0xff] %v1383_v43 }
 0x23b   : > { %2004 = shalt.err (!%p2001_p10)
}
 0x23c   : > { %s2063_s20 = smov 256  }
 0x23d   : > { %1802 = dma.vmem_to_hbm [thread:$0]  (%p2156_p7), %s1403_s26, 2048, %s1405_s23, %s1390_s19, %s2063_s20, %s2063_s20, %s2055_s11  }
 0x23e PF: > { %s1419_s5 = sand.u32 1, %s2035_s15   ;;  %p2800_p12 = scmp.ge.s32.totalorder %s2047_s18, 2 }
 0x23f   : > { %s1420_s10 = scalar_lea.sflag [#allocation5], %s1419_s5 }
 0x240   : > { %p1813_p13 = pnand %p2800_p12, %p2124_p6 }
 0x242   : > { %p1814_p0 = pneg %p1813_p13 }
 0x244   : > { %2030 = dma.done.wait (%p1814_p0), %s1420_s10, 2048  }
 0x245   : > { %2032 = vsyncadd (%p1814_p0), %s1420_s10, 4294965248  ;;  %p18_p3 = scmp.ge.s32.totalorder %s2142_s29, 4   ;;  %s2801_s15 = smov %s2039_s16 }
 0x246   : > { %s2802_s16 = smov %s2043_s17  ;;  %s2803_s17 = smov %s2152_s8 }
 0x247   : > { %s2804_s18 = smov %s2142_s29  ;;  %20 = sbr.rel (!%p18_p3) target bundleno = 6 (0x6), region = 85 }
 0x24c   :  { %1426 = vsyncpa [#allocation4], 1 }
 0x24d   :  { %1428 = vsyncpa [#allocation4 + $0x1], 1 }
 0x24e   :  { %1429 = vsyncpa [#allocation7], 1 }
 0x24f   :  { %1430 = vsyncpa [#allocation5], 1 }
 0x250   :  { %1432 = vsyncpa [#allocation5 + $0x1], 1 }

</bundles_post_ra>
